<compile_context>
chip_gen: v5e
topology: v5e:2x2
jax: 0.10.0
libtpu: 0.0.40
codegen_flags: <defaults>
</compile_context>

<pallas_src>
import functools

import jax
import jax.numpy as jnp
from jax.experimental import pallas as pl
from jax.experimental.pallas import tpu as pltpu

# ----------------------------- small config ---------------------------------
N_EMBD = 32          # torch config used 256; scaled down for the demo
N_HEAD = 4
HEAD_DIM = N_EMBD // N_HEAD
N_LAYER = 2
BLOCK_SIZE = 16
N_EXPERTS = 4
HIDDEN = 4 * N_EMBD          # per-expert FFN hidden width (=128, lane-dense)
VOCAB_SIZE = 64
VOCAB_PAD = 128              # lane-dense logits (next multiple of 128)
MOE_LOSS_COEF = 0.01
LN_EPS = 1e-5
NEG_BIG = -1e30


def _layernorm(x, g, b):
    mu = jnp.mean(x, axis=-1, keepdims=True)
    var = jnp.mean((x - mu) ** 2, axis=-1, keepdims=True)
    return (x - mu) * jax.lax.rsqrt(var + LN_EPS) * g + b


# =============================================================================
# Fused kernel.  Grid = (B, L): batch tiles ("parallel") x layers ("arbitrary").
# The residual stream for the current batch tile stays in a VMEM scratch slab.
# =============================================================================
def fused_forward_kernel(
        x_ref,
        ln1_g_ref, ln1_b_ref, wq_ref, wk_ref, wv_ref, wproj_ref, bproj_ref,
        ln2_g_ref, ln2_b_ref, wg_ref, bg_ref, w1_ref, b1_ref, w2_ref, b2_ref,
        lnf_g_ref, lnf_b_ref, wlm_ref, blm_ref,
        logits_ref, imp_ref, load_ref,
        x_scr,
        *, seq, n_layer, n_head, head_dim, n_experts, hidden):
    T, H, hd, E = seq, n_head, head_dim, n_experts
    C = H * hd
    l = pl.program_id(1)

    # ---- first layer of this batch tile: load activations, zero MoE stats ----
    @pl.when(l == 0)
    def _():
        x_scr[...] = x_ref[0]
        imp_ref[...] = jnp.zeros_like(imp_ref)
        load_ref[...] = jnp.zeros_like(load_ref)

    x = x_scr[...]                                           # (T, C) f32 residual

    causal = (jax.lax.broadcasted_iota(jnp.int32, (T, T), 0)
              >= jax.lax.broadcasted_iota(jnp.int32, (T, T), 1))
    scale = float(hd) ** -0.5

    # ------------------ LN1 -> causal multi-head attention -> residual -------
    h = _layernorm(x, ln1_g_ref[0], ln1_b_ref[0])
    hb = h.astype(jnp.bfloat16)

    def heads(mat):        # (T, C) -> (H, T, hd): token-major -> head-major
        return mat.reshape(T, H, hd).transpose(1, 0, 2)

    q = heads(jnp.dot(hb, wq_ref[0], preferred_element_type=jnp.float32))
    k = heads(jnp.dot(hb, wk_ref[0], preferred_element_type=jnp.float32))
    v = heads(jnp.dot(hb, wv_ref[0], preferred_element_type=jnp.float32))

    att = jnp.einsum('hqd,hkd->hqk',
                     q.astype(jnp.bfloat16), k.astype(jnp.bfloat16),
                     preferred_element_type=jnp.float32) * scale
    att = jnp.where(causal[None], att, NEG_BIG)
    att = att - jnp.max(att, axis=-1, keepdims=True)
    p = jnp.exp(att)
    p = p * pl.reciprocal(jnp.sum(p, axis=-1, keepdims=True), approx=True)
    ao = jnp.einsum('hqk,hkd->hqd',
                    p.astype(jnp.bfloat16), v.astype(jnp.bfloat16),
                    preferred_element_type=jnp.float32)       # (H, T, hd)
    ao = ao.transpose(1, 0, 2).reshape(T, C)
    ao = jnp.dot(ao.astype(jnp.bfloat16), wproj_ref[0],
                 preferred_element_type=jnp.float32) + bproj_ref[0]
    x = x + ao

    # ------------------ LN2 -> top-1 sparse MoE FFN -> residual ---------------
    h = _layernorm(x, ln2_g_ref[0], ln2_b_ref[0])
    hb = h.astype(jnp.bfloat16)

    # Router: exact softmax (routing / aux-loss numerics stay tight).
    glog = jnp.dot(hb, wg_ref[0], preferred_element_type=jnp.float32) + bg_ref[0]
    glog = glog - jnp.max(glog, axis=-1, keepdims=True)
    ge = jnp.exp(glog)
    scores = ge / jnp.sum(ge, axis=-1, keepdims=True)                   # (T, E)
    top = jnp.max(scores, axis=-1, keepdims=True)                       # (T, 1)
    lane = jax.lax.broadcasted_iota(jnp.int32, (T, E), 1)
    firstmax = jnp.min(jnp.where(scores == top, lane, E),
                       axis=-1, keepdims=True)                          # first-occurrence argmax
    onehot = lane == firstmax                                           # (T, E)
    gate = jnp.where(onehot, top, 0.0)                                  # (T, E)

    # Per-(batch-tile, layer) load-balancing statistics; reduced in JAX glue.
    importance = jnp.sum(scores, axis=0, keepdims=True)                 # (1, E)
    load = jnp.sum(onehot.astype(jnp.float32), axis=0, keepdims=True)   # (1, E)
    layer_onehot = (jax.lax.broadcasted_iota(jnp.int32, (1, n_layer, 1), 1)
                    == l).astype(jnp.float32)                           # (1, L, 1)
    imp_ref[...] += layer_onehot * importance[:, None, :]
    load_ref[...] += layer_onehot * load[:, None, :]

    # Fused dense experts: two big MXU matmuls instead of E small ones.
    h1 = jnp.dot(hb, w1_ref[0], preferred_element_type=jnp.float32) + b1_ref[0]
    h1 = jnp.maximum(h1, 0.0)                                           # (T, E*HID)
    h1 = (h1.reshape(T, E, hidden) * gate[:, :, None]).reshape(T, E * hidden)
    ff = jnp.dot(h1.astype(jnp.bfloat16), w2_ref[0],
                 preferred_element_type=jnp.float32)
    ff = ff + jnp.dot(gate, b2_ref[0], preferred_element_type=jnp.float32)
    x = x + ff

    x_scr[...] = x                     # persist residual stream for layer l+1

    # ------------------ final LN -> lm_head (lane-dense, bf16) ----------------
    @pl.when(l == n_layer - 1)
    def _():
        hf = _layernorm(x, lnf_g_ref[...], lnf_b_ref[...])
        logits = jnp.dot(hf.astype(jnp.bfloat16), wlm_ref[...],
                         preferred_element_type=jnp.float32) + blm_ref[...]
        logits_ref[0] = logits.astype(logits_ref.dtype)


def gpt_forward_pallas(params, x_emb):
    B, T, C = x_emb.shape
    L, E, HID = N_LAYER, N_EXPERTS, HIDDEN

    kernel = functools.partial(
        fused_forward_kernel, seq=T, n_layer=L, n_head=N_HEAD,
        head_dim=HEAD_DIM, n_experts=E, hidden=HID)

    def layer_spec(p):     # stacked per-layer weight: stream one layer at a time
        shp = p.shape
        return pl.BlockSpec((1,) + shp[1:],
                            lambda b, l: (l,) + (0,) * (len(shp) - 1))

    def const_spec(p):     # final-LN / lm_head weights: resident for all steps
        shp = p.shape
        return pl.BlockSpec(shp, lambda b, l: (0,) * len(shp))

    in_arrays = [
        x_emb,
        params["ln1_g"], params["ln1_b"],
        params["wq"], params["wk"], params["wv"],
        params["wproj"], params["bproj"],
        params["ln2_g"], params["ln2_b"],
        params["wg"], params["bg"],
        params["w1"], params["b1"], params["w2"], params["b2"],
        params["lnf_g"], params["lnf_b"], params["w_lm"], params["b_lm"],
    ]
    in_specs = [pl.BlockSpec((1, T, C), lambda b, l: (b, 0, 0))]
    in_specs += [layer_spec(p) for p in in_arrays[1:16]]
    in_specs += [const_spec(p) for p in in_arrays[16:]]

    out_shape = (
        jax.ShapeDtypeStruct((B, T, VOCAB_PAD), jnp.bfloat16),  # logits (padded)
        jax.ShapeDtypeStruct((B, L, E), jnp.float32),            # importance stats
        jax.ShapeDtypeStruct((B, L, E), jnp.float32),            # load stats
    )
    out_specs = (
        pl.BlockSpec((1, T, VOCAB_PAD), lambda b, l: (b, 0, 0)),
        pl.BlockSpec((1, L, E), lambda b, l: (b, 0, 0)),
        pl.BlockSpec((1, L, E), lambda b, l: (b, 0, 0)),
    )

    logits, imp, load = pl.pallas_call(
        kernel,
        grid=(B, L),
        in_specs=in_specs,
        out_specs=out_specs,
        out_shape=out_shape,
        scratch_shapes=[pltpu.VMEM((T, C), jnp.float32)],   # residual-stream slab
        compiler_params=pltpu.CompilerParams(
            dimension_semantics=("parallel", "arbitrary"),
            vmem_limit_bytes=64 * 1024 * 1024),
    )(*in_arrays)
    return logits, imp, load


# =============================================================================
# Parameter init (matches torch _init_weights: linear / embedding weights
# ~ N(0, 0.02), biases 0, LayerNorm gamma=1 beta=0).  Per-layer tensors are
# stacked along a leading layer axis; matmul weights are stored in bf16.
# =============================================================================
def init_params(key):
    L, C, E, HID = N_LAYER, N_EMBD, N_EXPERTS, HIDDEN

    def nrm(k, shape):
        return 0.02 * jax.random.normal(k, shape, dtype=jnp.float32)

    keys = jax.random.split(key, 10)
    w_lm = jnp.zeros((C, VOCAB_PAD), jnp.float32)
    w_lm = w_lm.at[:, :VOCAB_SIZE].set(nrm(keys[2], (C, VOCAB_SIZE)))

    params = {
        "tok_emb": nrm(keys[0], (VOCAB_SIZE, C)),
        "pos_emb": nrm(keys[1], (BLOCK_SIZE, C)),
        "lnf_g": jnp.ones((1, C), jnp.float32),
        "lnf_b": jnp.zeros((1, C), jnp.float32),
        "w_lm": w_lm.astype(jnp.bfloat16),                 # padded, lane-dense
        "b_lm": jnp.zeros((1, VOCAB_PAD), jnp.float32),
        # per-layer (stacked) block parameters
        "ln1_g": jnp.ones((L, 1, C), jnp.float32),
        "ln1_b": jnp.zeros((L, 1, C), jnp.float32),
        "ln2_g": jnp.ones((L, 1, C), jnp.float32),
        "ln2_b": jnp.zeros((L, 1, C), jnp.float32),
        "wq": nrm(keys[3], (L, C, C)).astype(jnp.bfloat16),
        "wk": nrm(keys[4], (L, C, C)).astype(jnp.bfloat16),
        "wv": nrm(keys[5], (L, C, C)).astype(jnp.bfloat16),
        "wproj": nrm(keys[6], (L, C, C)).astype(jnp.bfloat16),
        "bproj": jnp.zeros((L, 1, C), jnp.float32),
        "wg": nrm(keys[7], (L, C, E)).astype(jnp.bfloat16),
        "bg": jnp.zeros((L, 1, E), jnp.float32),
        # experts concatenated along the hidden dim -> one big matmul each way
        "w1": nrm(keys[8], (L, C, E * HID)).astype(jnp.bfloat16),
        "b1": jnp.zeros((L, 1, E * HID), jnp.float32),
        "w2": nrm(keys[9], (L, E * HID, C)).astype(jnp.bfloat16),
        "b2": jnp.zeros((L, E, C), jnp.float32),
    }
    return params


# =============================================================================
# Full forward (glue: embedding lookup, aux-loss reduction across batch tiles,
# cross-entropy loss; the transformer itself runs inside the Pallas kernel).
# =============================================================================
def forward(params, idx, targets=None):
    B, T = idx.shape
    tok = jnp.take(params["tok_emb"], idx, axis=0)           # (B, T, C)
    pos = params["pos_emb"][:T]                               # (T, C)
    x = tok + pos[None, :, :]

    logits_pad, imp, load = gpt_forward_pallas(params, x)
    logits = logits_pad[:, :, :VOCAB_SIZE].astype(jnp.float32)   # drop lane pad

    # aux loss: importance/load summed over batch tiles per layer, then
    # aux_l = E * sum_e (imp/N) * (load/N), summed over layers.
    n_tok = B * T
    imp_tot = jnp.sum(imp, axis=0)                            # (L, E)
    load_tot = jnp.sum(load, axis=0)                          # (L, E)
    total_aux = (N_EXPERTS / float(n_tok * n_tok)) * jnp.sum(imp_tot * load_tot)

    loss = None
    if targets is not None:
        lse = jax.scipy.special.logsumexp(logits, axis=-1)    # (B, T)
        tgt = jnp.take_along_axis(logits, targets[..., None], axis=-1)[..., 0]
        ce = jnp.mean(lse - tgt)
        loss = ce + MOE_LOSS_COEF * total_aux
    return logits, loss


# =============================================================================
if __name__ == "__main__":
    key = jax.random.PRNGKey(0)
    pkey, ikey, tkey = jax.random.split(key, 3)

    params = init_params(pkey)

    B, T = 2, 8
    idx = jax.random.randint(ikey, (B, T), 0, VOCAB_SIZE, dtype=jnp.int32)
    targets = jax.random.randint(tkey, (B, T), 0, VOCAB_SIZE, dtype=jnp.int32)

    logits, loss = forward(params, idx, targets)
    jax.block_until_ready(logits)
    jax.block_until_ready(loss)

    assert logits.shape == (B, T, VOCAB_SIZE)
    assert bool(jnp.isfinite(loss))
    print("KERNEL_OK")
</pallas_src>

<mosaic_0001>
module attributes {stable_mosaic.version = 11 : i64} {
  func.func @fused_forward_kernel(%arg0: i32, %arg1: i32, %arg2: memref<1x8x32xf32, #tpu.memory_space<vmem>>, %arg3: memref<1x1x32xf32, #tpu.memory_space<vmem>>, %arg4: memref<1x1x32xf32, #tpu.memory_space<vmem>>, %arg5: memref<1x32x32xbf16, #tpu.memory_space<vmem>>, %arg6: memref<1x32x32xbf16, #tpu.memory_space<vmem>>, %arg7: memref<1x32x32xbf16, #tpu.memory_space<vmem>>, %arg8: memref<1x32x32xbf16, #tpu.memory_space<vmem>>, %arg9: memref<1x1x32xf32, #tpu.memory_space<vmem>>, %arg10: memref<1x1x32xf32, #tpu.memory_space<vmem>>, %arg11: memref<1x1x32xf32, #tpu.memory_space<vmem>>, %arg12: memref<1x32x4xbf16, #tpu.memory_space<vmem>>, %arg13: memref<1x1x4xf32, #tpu.memory_space<vmem>>, %arg14: memref<1x32x512xbf16, #tpu.memory_space<vmem>>, %arg15: memref<1x1x512xf32, #tpu.memory_space<vmem>>, %arg16: memref<1x512x32xbf16, #tpu.memory_space<vmem>>, %arg17: memref<1x4x32xf32, #tpu.memory_space<vmem>>, %arg18: memref<1x32xf32, #tpu.memory_space<vmem>>, %arg19: memref<1x32xf32, #tpu.memory_space<vmem>>, %arg20: memref<32x128xbf16, #tpu.memory_space<vmem>>, %arg21: memref<1x128xf32, #tpu.memory_space<vmem>>, %arg22: memref<1x8x128xbf16, #tpu.memory_space<vmem>>, %arg23: memref<1x2x4xf32, #tpu.memory_space<vmem>>, %arg24: memref<1x2x4xf32, #tpu.memory_space<vmem>>, %arg25: memref<8x32xf32, #tpu.memory_space<vmem>>) attributes {dimension_semantics = [#tpu.dimension_semantics<parallel>, #tpu.dimension_semantics<arbitrary>], iteration_bounds = array<i64: 2, 2>, scalar_prefetch = 0 : i64, scratch_operands = 1 : i64, tpu.core_type = #tpu.core_type<tc>, window_params = [{transform_indices = @transform_0, window_bounds = array<i64: 1, 8, 32>}, {transform_indices = @transform_1, window_bounds = array<i64: 1, 1, 32>}, {transform_indices = @transform_2, window_bounds = array<i64: 1, 1, 32>}, {transform_indices = @transform_3, window_bounds = array<i64: 1, 32, 32>}, {transform_indices = @transform_4, window_bounds = array<i64: 1, 32, 32>}, {transform_indices = @transform_5, window_bounds = array<i64: 1, 32, 32>}, {transform_indices = @transform_6, window_bounds = array<i64: 1, 32, 32>}, {transform_indices = @transform_7, window_bounds = array<i64: 1, 1, 32>}, {transform_indices = @transform_8, window_bounds = array<i64: 1, 1, 32>}, {transform_indices = @transform_9, window_bounds = array<i64: 1, 1, 32>}, {transform_indices = @transform_10, window_bounds = array<i64: 1, 32, 4>}, {transform_indices = @transform_11, window_bounds = array<i64: 1, 1, 4>}, {transform_indices = @transform_12, window_bounds = array<i64: 1, 32, 512>}, {transform_indices = @transform_13, window_bounds = array<i64: 1, 1, 512>}, {transform_indices = @transform_14, window_bounds = array<i64: 1, 512, 32>}, {transform_indices = @transform_15, window_bounds = array<i64: 1, 4, 32>}, {pipeline_mode = #tpu.pipeline_mode<synchronous>, transform_indices = @transform_16, window_bounds = array<i64: 1, 32>}, {pipeline_mode = #tpu.pipeline_mode<synchronous>, transform_indices = @transform_17, window_bounds = array<i64: 1, 32>}, {pipeline_mode = #tpu.pipeline_mode<synchronous>, transform_indices = @transform_18, window_bounds = array<i64: 32, 128>}, {pipeline_mode = #tpu.pipeline_mode<synchronous>, transform_indices = @transform_19, window_bounds = array<i64: 1, 128>}, {transform_indices = @transform_20, window_bounds = array<i64: 1, 8, 128>}, {transform_indices = @transform_21, window_bounds = array<i64: 1, 2, 4>}, {transform_indices = @transform_22, window_bounds = array<i64: 1, 2, 4>}]} {
    %c0_i32 = arith.constant 0 : i32
    %0 = arith.cmpi eq, %arg1, %c0_i32 : i32
    %1 = arith.extui %0 : i1 to i32
    %c0_i32_0 = arith.constant 0 : i32
    %2 = arith.cmpi ne, %1, %c0_i32_0 : i32
    scf.if %2 {
      %c0_93 = arith.constant 0 : index
      %c0_94 = arith.constant 0 : index
      %c0_95 = arith.constant 0 : index
      %193 = vector.load %arg2[%c0_93, %c0_94, %c0_95] : memref<1x8x32xf32, #tpu.memory_space<vmem>>, vector<1x8x32xf32>
      %194 = vector.shape_cast %193 : vector<1x8x32xf32> to vector<8x32xf32>
      %c0_96 = arith.constant 0 : index
      %c0_97 = arith.constant 0 : index
      %195 = vector.load %arg25[%c0_96, %c0_97] : memref<8x32xf32, #tpu.memory_space<vmem>>, vector<8x32xf32>
      tpu.vector_store %arg25[%c0_96, %c0_97], %194 {strides = array<i32>} : memref<8x32xf32, #tpu.memory_space<vmem>>, vector<8x32xf32>,
      %cst_98 = arith.constant 0.000000e+00 : f32
      %196 = vector.broadcast %cst_98 : f32 to vector<1x2x4xf32>
      %c0_99 = arith.constant 0 : index
      %c0_100 = arith.constant 0 : index
      %c0_101 = arith.constant 0 : index
      %197 = vector.load %arg23[%c0_99, %c0_100, %c0_101] : memref<1x2x4xf32, #tpu.memory_space<vmem>>, vector<1x2x4xf32>
      tpu.vector_store %arg23[%c0_99, %c0_100, %c0_101], %196 {strides = array<i32>} : memref<1x2x4xf32, #tpu.memory_space<vmem>>, vector<1x2x4xf32>,
      %cst_102 = arith.constant 0.000000e+00 : f32
      %198 = vector.broadcast %cst_102 : f32 to vector<1x2x4xf32>
      %c0_103 = arith.constant 0 : index
      %c0_104 = arith.constant 0 : index
      %c0_105 = arith.constant 0 : index
      %199 = vector.load %arg24[%c0_103, %c0_104, %c0_105] : memref<1x2x4xf32, #tpu.memory_space<vmem>>, vector<1x2x4xf32>
      tpu.vector_store %arg24[%c0_103, %c0_104, %c0_105], %198 {strides = array<i32>} : memref<1x2x4xf32, #tpu.memory_space<vmem>>, vector<1x2x4xf32>,
    } else {
    }
    %c0 = arith.constant 0 : index
    %c0_1 = arith.constant 0 : index
    %3 = vector.load %arg25[%c0, %c0_1] : memref<8x32xf32, #tpu.memory_space<vmem>>, vector<8x32xf32>
    %4 = tpu.iota {dimensions = array<i32: 0>} : vector<8x8xi32>
    %5 = tpu.iota {dimensions = array<i32: 1>} : vector<8x8xi32>
    %6 = arith.cmpi sge, %4, %5 : vector<8x8xi32>
    %c0_2 = arith.constant 0 : index
    %c0_3 = arith.constant 0 : index
    %c0_4 = arith.constant 0 : index
    %7 = vector.load %arg3[%c0_2, %c0_3, %c0_4] : memref<1x1x32xf32, #tpu.memory_space<vmem>>, vector<1x1x32xf32>
    %8 = vector.shape_cast %7 : vector<1x1x32xf32> to vector<1x32xf32>
    %c0_5 = arith.constant 0 : index
    %c0_6 = arith.constant 0 : index
    %c0_7 = arith.constant 0 : index
    %9 = vector.load %arg4[%c0_5, %c0_6, %c0_7] : memref<1x1x32xf32, #tpu.memory_space<vmem>>, vector<1x1x32xf32>
    %10 = vector.shape_cast %9 : vector<1x1x32xf32> to vector<1x32xf32>
    %cst = arith.constant dense<0.000000e+00> : vector<8xf32>
    %11 = vector.multi_reduction <add>, %3, %cst [1] : vector<8x32xf32> to vector<8xf32>
    %12 = vector.shape_cast %11 : vector<8xf32> to vector<8x1xf32>
    %cst_8 = arith.constant 3.200000e+01 : f32
    %13 = vector.broadcast %cst_8 : f32 to vector<8x1xf32>
    %14 = arith.divf %12, %13 : vector<8x1xf32>
    %15 = vector.broadcast %14 : vector<8x1xf32> to vector<8x32xf32>
    %16 = arith.subf %3, %15 : vector<8x32xf32>
    %17 = arith.mulf %16, %16 : vector<8x32xf32>
    %cst_9 = arith.constant dense<0.000000e+00> : vector<8xf32>
    %18 = vector.multi_reduction <add>, %17, %cst_9 [1] : vector<8x32xf32> to vector<8xf32>
    %19 = vector.shape_cast %18 : vector<8xf32> to vector<8x1xf32>
    %cst_10 = arith.constant 3.200000e+01 : f32
    %20 = vector.broadcast %cst_10 : f32 to vector<8x1xf32>
    %21 = arith.divf %19, %20 : vector<8x1xf32>
    %22 = vector.broadcast %14 : vector<8x1xf32> to vector<8x32xf32>
    %23 = arith.subf %3, %22 : vector<8x32xf32>
    %cst_11 = arith.constant 9.99999974E-6 : f32
    %24 = vector.broadcast %cst_11 : f32 to vector<8x1xf32>
    %25 = arith.addf %21, %24 : vector<8x1xf32>
    %26 = math.rsqrt %25 : vector<8x1xf32>
    %27 = vector.broadcast %26 : vector<8x1xf32> to vector<8x32xf32>
    %28 = arith.mulf %23, %27 : vector<8x32xf32>
    %29 = vector.broadcast %8 : vector<1x32xf32> to vector<8x32xf32>
    %30 = arith.mulf %28, %29 : vector<8x32xf32>
    %31 = vector.broadcast %10 : vector<1x32xf32> to vector<8x32xf32>
    %32 = arith.addf %30, %31 : vector<8x32xf32>
    %33 = arith.truncf %32 : vector<8x32xf32> to vector<8x32xbf16>
    %c0_12 = arith.constant 0 : index
    %c0_13 = arith.constant 0 : index
    %c0_14 = arith.constant 0 : index
    %34 = vector.load %arg5[%c0_12, %c0_13, %c0_14] : memref<1x32x32xbf16, #tpu.memory_space<vmem>>, vector<1x32x32xbf16>
    %35 = vector.shape_cast %34 : vector<1x32x32xbf16> to vector<32x32xbf16>
    %cst_15 = arith.constant dense<0.000000e+00> : vector<8x32xf32>
    %36 = tpu.matmul %33, %35, %cst_15 {dimension_numbers = #tpu.dot_dimension_numbers<[1], [0], [0], [1], [0, 0, 1, 1], [], []>} : vector<8x32xbf16>, vector<32x32xbf16>, vector<8x32xf32> -> vector<8x32xf32>
    %37 = vector.shape_cast %36 : vector<8x32xf32> to vector<8x4x8xf32>
    %38 = tpu.transpose %37, [1, 0, 2] : vector<8x4x8xf32> -> vector<4x8x8xf32>
    %c0_16 = arith.constant 0 : index
    %c0_17 = arith.constant 0 : index
    %c0_18 = arith.constant 0 : index
    %39 = vector.load %arg6[%c0_16, %c0_17, %c0_18] : memref<1x32x32xbf16, #tpu.memory_space<vmem>>, vector<1x32x32xbf16>
    %40 = vector.shape_cast %39 : vector<1x32x32xbf16> to vector<32x32xbf16>
    %cst_19 = arith.constant dense<0.000000e+00> : vector<8x32xf32>
    %41 = tpu.matmul %33, %40, %cst_19 {dimension_numbers = #tpu.dot_dimension_numbers<[1], [0], [0], [1], [0, 0, 1, 1], [], []>} : vector<8x32xbf16>, vector<32x32xbf16>, vector<8x32xf32> -> vector<8x32xf32>
    %42 = vector.shape_cast %41 : vector<8x32xf32> to vector<8x4x8xf32>
    %43 = tpu.transpose %42, [1, 0, 2] : vector<8x4x8xf32> -> vector<4x8x8xf32>
    %c0_20 = arith.constant 0 : index
    %c0_21 = arith.constant 0 : index
    %c0_22 = arith.constant 0 : index
    %44 = vector.load %arg7[%c0_20, %c0_21, %c0_22] : memref<1x32x32xbf16, #tpu.memory_space<vmem>>, vector<1x32x32xbf16>
    %45 = vector.shape_cast %44 : vector<1x32x32xbf16> to vector<32x32xbf16>
    %cst_23 = arith.constant dense<0.000000e+00> : vector<8x32xf32>
    %46 = tpu.matmul %33, %45, %cst_23 {dimension_numbers = #tpu.dot_dimension_numbers<[1], [0], [0], [1], [0, 0, 1, 1], [], []>} : vector<8x32xbf16>, vector<32x32xbf16>, vector<8x32xf32> -> vector<8x32xf32>
    %47 = vector.shape_cast %46 : vector<8x32xf32> to vector<8x4x8xf32>
    %48 = tpu.transpose %47, [1, 0, 2] : vector<8x4x8xf32> -> vector<4x8x8xf32>
    %49 = arith.truncf %38 : vector<4x8x8xf32> to vector<4x8x8xbf16>
    %50 = arith.truncf %43 : vector<4x8x8xf32> to vector<4x8x8xbf16>
    "tpu.trace_start"() <{level = 10 : i32, message = "hqd,hkd->hqk"}> : () -> ()
    %cst_24 = arith.constant dense<0.000000e+00> : vector<4x8x8xf32>
    %51 = tpu.matmul %49, %50, %cst_24 {dimension_numbers = #tpu.dot_dimension_numbers<[2], [2], [1], [1], [0, 0, 0, 1, 1, 1], [0], [0]>} : vector<4x8x8xbf16>, vector<4x8x8xbf16>, vector<4x8x8xf32> -> vector<4x8x8xf32>
    "tpu.trace_stop"() : () -> ()
    %cst_25 = arith.constant 0.353553385 : f32
    %52 = vector.broadcast %cst_25 : f32 to vector<4x8x8xf32>
    %53 = arith.mulf %51, %52 : vector<4x8x8xf32>
    %54 = vector.shape_cast %6 : vector<8x8xi1> to vector<1x8x8xi1>
    %cst_26 = arith.constant -1.000000e+30 : f32
    %55 = vector.shape_cast %54 : vector<1x8x8xi1> to vector<1x8x8xi1>
    %56 = vector.broadcast %55 : vector<1x8x8xi1> to vector<4x8x8xi1>
    %57 = vector.broadcast %cst_26 : f32 to vector<4x8x8xf32>
    %58 = arith.select %56, %53, %57 : vector<4x8x8xi1>, vector<4x8x8xf32>
    %cst_27 = arith.constant dense<0xFF800000> : vector<4x8xf32>
    %59 = vector.multi_reduction <maximumf>, %58, %cst_27 [2] : vector<4x8x8xf32> to vector<4x8xf32>
    %60 = vector.shape_cast %59 : vector<4x8xf32> to vector<4x8x1xf32>
    %61 = vector.broadcast %60 : vector<4x8x1xf32> to vector<4x8x8xf32>
    %62 = arith.subf %58, %61 : vector<4x8x8xf32>
    %63 = math.exp %62 : vector<4x8x8xf32>
    %cst_28 = arith.constant dense<0.000000e+00> : vector<4x8xf32>
    %64 = vector.multi_reduction <add>, %63, %cst_28 [2] : vector<4x8x8xf32> to vector<4x8xf32>
    %65 = vector.shape_cast %64 : vector<4x8xf32> to vector<4x8x1xf32>
    %66 = tpu.reciprocal %65 {approx = true} : vector<4x8x1xf32> -> vector<4x8x1xf32>
    %67 = vector.broadcast %66 : vector<4x8x1xf32> to vector<4x8x8xf32>
    %68 = arith.mulf %63, %67 : vector<4x8x8xf32>
    %69 = arith.truncf %68 : vector<4x8x8xf32> to vector<4x8x8xbf16>
    %70 = arith.truncf %48 : vector<4x8x8xf32> to vector<4x8x8xbf16>
    "tpu.trace_start"() <{level = 10 : i32, message = "hqk,hkd->hqd"}> : () -> ()
    %cst_29 = arith.constant dense<0.000000e+00> : vector<4x8x8xf32>
    %71 = tpu.matmul %69, %70, %cst_29 {dimension_numbers = #tpu.dot_dimension_numbers<[2], [1], [1], [2], [0, 0, 0, 1, 1, 2], [0], [0]>} : vector<4x8x8xbf16>, vector<4x8x8xbf16>, vector<4x8x8xf32> -> vector<4x8x8xf32>
    "tpu.trace_stop"() : () -> ()
    %72 = tpu.transpose %71, [1, 0, 2] : vector<4x8x8xf32> -> vector<8x4x8xf32>
    %73 = vector.shape_cast %72 : vector<8x4x8xf32> to vector<8x32xf32>
    %74 = arith.truncf %73 : vector<8x32xf32> to vector<8x32xbf16>
    %c0_30 = arith.constant 0 : index
    %c0_31 = arith.constant 0 : index
    %c0_32 = arith.constant 0 : index
    %75 = vector.load %arg8[%c0_30, %c0_31, %c0_32] : memref<1x32x32xbf16, #tpu.memory_space<vmem>>, vector<1x32x32xbf16>
    %76 = vector.shape_cast %75 : vector<1x32x32xbf16> to vector<32x32xbf16>
    %cst_33 = arith.constant dense<0.000000e+00> : vector<8x32xf32>
    %77 = tpu.matmul %74, %76, %cst_33 {dimension_numbers = #tpu.dot_dimension_numbers<[1], [0], [0], [1], [0, 0, 1, 1], [], []>} : vector<8x32xbf16>, vector<32x32xbf16>, vector<8x32xf32> -> vector<8x32xf32>
    %c0_34 = arith.constant 0 : index
    %c0_35 = arith.constant 0 : index
    %c0_36 = arith.constant 0 : index
    %78 = vector.load %arg9[%c0_34, %c0_35, %c0_36] : memref<1x1x32xf32, #tpu.memory_space<vmem>>, vector<1x1x32xf32>
    %79 = vector.shape_cast %78 : vector<1x1x32xf32> to vector<1x32xf32>
    %80 = vector.broadcast %79 : vector<1x32xf32> to vector<8x32xf32>
    %81 = arith.addf %77, %80 : vector<8x32xf32>
    %82 = arith.addf %3, %81 : vector<8x32xf32>
    %c0_37 = arith.constant 0 : index
    %c0_38 = arith.constant 0 : index
    %c0_39 = arith.constant 0 : index
    %83 = vector.load %arg10[%c0_37, %c0_38, %c0_39] : memref<1x1x32xf32, #tpu.memory_space<vmem>>, vector<1x1x32xf32>
    %84 = vector.shape_cast %83 : vector<1x1x32xf32> to vector<1x32xf32>
    %c0_40 = arith.constant 0 : index
    %c0_41 = arith.constant 0 : index
    %c0_42 = arith.constant 0 : index
    %85 = vector.load %arg11[%c0_40, %c0_41, %c0_42] : memref<1x1x32xf32, #tpu.memory_space<vmem>>, vector<1x1x32xf32>
    %86 = vector.shape_cast %85 : vector<1x1x32xf32> to vector<1x32xf32>
    %cst_43 = arith.constant dense<0.000000e+00> : vector<8xf32>
    %87 = vector.multi_reduction <add>, %82, %cst_43 [1] : vector<8x32xf32> to vector<8xf32>
    %88 = vector.shape_cast %87 : vector<8xf32> to vector<8x1xf32>
    %cst_44 = arith.constant 3.200000e+01 : f32
    %89 = vector.broadcast %cst_44 : f32 to vector<8x1xf32>
    %90 = arith.divf %88, %89 : vector<8x1xf32>
    %91 = vector.broadcast %90 : vector<8x1xf32> to vector<8x32xf32>
    %92 = arith.subf %82, %91 : vector<8x32xf32>
    %93 = arith.mulf %92, %92 : vector<8x32xf32>
    %cst_45 = arith.constant dense<0.000000e+00> : vector<8xf32>
    %94 = vector.multi_reduction <add>, %93, %cst_45 [1] : vector<8x32xf32> to vector<8xf32>
    %95 = vector.shape_cast %94 : vector<8xf32> to vector<8x1xf32>
    %cst_46 = arith.constant 3.200000e+01 : f32
    %96 = vector.broadcast %cst_46 : f32 to vector<8x1xf32>
    %97 = arith.divf %95, %96 : vector<8x1xf32>
    %98 = vector.broadcast %90 : vector<8x1xf32> to vector<8x32xf32>
    %99 = arith.subf %82, %98 : vector<8x32xf32>
    %cst_47 = arith.constant 9.99999974E-6 : f32
    %100 = vector.broadcast %cst_47 : f32 to vector<8x1xf32>
    %101 = arith.addf %97, %100 : vector<8x1xf32>
    %102 = math.rsqrt %101 : vector<8x1xf32>
    %103 = vector.broadcast %102 : vector<8x1xf32> to vector<8x32xf32>
    %104 = arith.mulf %99, %103 : vector<8x32xf32>
    %105 = vector.broadcast %84 : vector<1x32xf32> to vector<8x32xf32>
    %106 = arith.mulf %104, %105 : vector<8x32xf32>
    %107 = vector.broadcast %86 : vector<1x32xf32> to vector<8x32xf32>
    %108 = arith.addf %106, %107 : vector<8x32xf32>
    %109 = arith.truncf %108 : vector<8x32xf32> to vector<8x32xbf16>
    %c0_48 = arith.constant 0 : index
    %c0_49 = arith.constant 0 : index
    %c0_50 = arith.constant 0 : index
    %110 = vector.load %arg12[%c0_48, %c0_49, %c0_50] : memref<1x32x4xbf16, #tpu.memory_space<vmem>>, vector<1x32x4xbf16>
    %111 = vector.shape_cast %110 : vector<1x32x4xbf16> to vector<32x4xbf16>
    %cst_51 = arith.constant dense<0.000000e+00> : vector<8x4xf32>
    %112 = tpu.matmul %109, %111, %cst_51 {dimension_numbers = #tpu.dot_dimension_numbers<[1], [0], [0], [1], [0, 0, 1, 1], [], []>} : vector<8x32xbf16>, vector<32x4xbf16>, vector<8x4xf32> -> vector<8x4xf32>
    %c0_52 = arith.constant 0 : index
    %c0_53 = arith.constant 0 : index
    %c0_54 = arith.constant 0 : index
    %113 = vector.load %arg13[%c0_52, %c0_53, %c0_54] : memref<1x1x4xf32, #tpu.memory_space<vmem>>, vector<1x1x4xf32>
    %114 = vector.shape_cast %113 : vector<1x1x4xf32> to vector<1x4xf32>
    %115 = vector.broadcast %114 : vector<1x4xf32> to vector<8x4xf32>
    %116 = arith.addf %112, %115 : vector<8x4xf32>
    %cst_55 = arith.constant dense<0xFF800000> : vector<8xf32>
    %117 = vector.multi_reduction <maximumf>, %116, %cst_55 [1] : vector<8x4xf32> to vector<8xf32>
    %118 = vector.shape_cast %117 : vector<8xf32> to vector<8x1xf32>
    %119 = vector.broadcast %118 : vector<8x1xf32> to vector<8x4xf32>
    %120 = arith.subf %116, %119 : vector<8x4xf32>
    %121 = math.exp %120 : vector<8x4xf32>
    %cst_56 = arith.constant dense<0.000000e+00> : vector<8xf32>
    %122 = vector.multi_reduction <add>, %121, %cst_56 [1] : vector<8x4xf32> to vector<8xf32>
    %123 = vector.shape_cast %122 : vector<8xf32> to vector<8x1xf32>
    %124 = vector.broadcast %123 : vector<8x1xf32> to vector<8x4xf32>
    %125 = arith.divf %121, %124 : vector<8x4xf32>
    %cst_57 = arith.constant dense<0xFF800000> : vector<8xf32>
    %126 = vector.multi_reduction <maximumf>, %125, %cst_57 [1] : vector<8x4xf32> to vector<8xf32>
    %127 = vector.shape_cast %126 : vector<8xf32> to vector<8x1xf32>
    %128 = tpu.iota {dimensions = array<i32: 1>} : vector<8x4xi32>
    %129 = vector.broadcast %127 : vector<8x1xf32> to vector<8x4xf32>
    %130 = arith.cmpf oeq, %125, %129 : vector<8x4xf32>
    %c4_i32 = arith.constant 4 : i32
    %131 = vector.broadcast %c4_i32 : i32 to vector<8x4xi32>
    %132 = arith.select %130, %128, %131 : vector<8x4xi1>, vector<8x4xi32>
    %cst_58 = arith.constant dense<2147483647> : vector<8xi32>
    %133 = vector.multi_reduction <minsi>, %132, %cst_58 [1] : vector<8x4xi32> to vector<8xi32>
    %134 = vector.shape_cast %133 : vector<8xi32> to vector<8x1xi32>
    %135 = vector.broadcast %134 : vector<8x1xi32> to vector<8x4xi32>
    %136 = arith.cmpi eq, %128, %135 : vector<8x4xi32>
    %cst_59 = arith.constant 0.000000e+00 : f32
    %137 = vector.shape_cast %127 : vector<8x1xf32> to vector<8x1xf32>
    %138 = vector.broadcast %137 : vector<8x1xf32> to vector<8x4xf32>
    %139 = vector.broadcast %cst_59 : f32 to vector<8x4xf32>
    %140 = arith.select %136, %138, %139 : vector<8x4xi1>, vector<8x4xf32>
    %cst_60 = arith.constant dense<0.000000e+00> : vector<4xf32>
    %141 = vector.multi_reduction <add>, %125, %cst_60 [0] : vector<8x4xf32> to vector<4xf32>
    %142 = vector.shape_cast %141 : vector<4xf32> to vector<1x4xf32>
    %143 = arith.extui %136 : vector<8x4xi1> to vector<8x4xi32>
    %144 = arith.sitofp %143 : vector<8x4xi32> to vector<8x4xf32>
    %cst_61 = arith.constant dense<0.000000e+00> : vector<4xf32>
    %145 = vector.multi_reduction <add>, %144, %cst_61 [0] : vector<8x4xf32> to vector<4xf32>
    %146 = vector.shape_cast %145 : vector<4xf32> to vector<1x4xf32>
    %147 = tpu.iota {dimensions = array<i32: 1>} : vector<1x2x1xi32>
    %148 = vector.broadcast %arg1 : i32 to vector<1x2x1xi32>
    %149 = arith.cmpi eq, %147, %148 : vector<1x2x1xi32>
    %150 = arith.extui %149 : vector<1x2x1xi1> to vector<1x2x1xi32>
    %151 = arith.sitofp %150 : vector<1x2x1xi32> to vector<1x2x1xf32>
    %c0_62 = arith.constant 0 : index
    %c0_63 = arith.constant 0 : index
    %c0_64 = arith.constant 0 : index
    %152 = vector.load %arg23[%c0_62, %c0_63, %c0_64] : memref<1x2x4xf32, #tpu.memory_space<vmem>>, vector<1x2x4xf32>
    %153 = vector.shape_cast %142 : vector<1x4xf32> to vector<1x1x4xf32>
    %154 = vector.broadcast %151 : vector<1x2x1xf32> to vector<1x2x4xf32>
    %155 = vector.broadcast %153 : vector<1x1x4xf32> to vector<1x2x4xf32>
    %156 = arith.mulf %154, %155 : vector<1x2x4xf32>
    %157 = arith.addf %152, %156 : vector<1x2x4xf32>
    %c0_65 = arith.constant 0 : index
    %c0_66 = arith.constant 0 : index
    %c0_67 = arith.constant 0 : index
    %158 = vector.load %arg23[%c0_65, %c0_66, %c0_67] : memref<1x2x4xf32, #tpu.memory_space<vmem>>, vector<1x2x4xf32>
    tpu.vector_store %arg23[%c0_65, %c0_66, %c0_67], %157 {strides = array<i32>} : memref<1x2x4xf32, #tpu.memory_space<vmem>>, vector<1x2x4xf32>,
    %c0_68 = arith.constant 0 : index
    %c0_69 = arith.constant 0 : index
    %c0_70 = arith.constant 0 : index
    %159 = vector.load %arg24[%c0_68, %c0_69, %c0_70] : memref<1x2x4xf32, #tpu.memory_space<vmem>>, vector<1x2x4xf32>
    %160 = vector.shape_cast %146 : vector<1x4xf32> to vector<1x1x4xf32>
    %161 = vector.broadcast %151 : vector<1x2x1xf32> to vector<1x2x4xf32>
    %162 = vector.broadcast %160 : vector<1x1x4xf32> to vector<1x2x4xf32>
    %163 = arith.mulf %161, %162 : vector<1x2x4xf32>
    %164 = arith.addf %159, %163 : vector<1x2x4xf32>
    %c0_71 = arith.constant 0 : index
    %c0_72 = arith.constant 0 : index
    %c0_73 = arith.constant 0 : index
    %165 = vector.load %arg24[%c0_71, %c0_72, %c0_73] : memref<1x2x4xf32, #tpu.memory_space<vmem>>, vector<1x2x4xf32>
    tpu.vector_store %arg24[%c0_71, %c0_72, %c0_73], %164 {strides = array<i32>} : memref<1x2x4xf32, #tpu.memory_space<vmem>>, vector<1x2x4xf32>,
    %c0_74 = arith.constant 0 : index
    %c0_75 = arith.constant 0 : index
    %c0_76 = arith.constant 0 : index
    %166 = vector.load %arg14[%c0_74, %c0_75, %c0_76] : memref<1x32x512xbf16, #tpu.memory_space<vmem>>, vector<1x32x512xbf16>
    %167 = vector.shape_cast %166 : vector<1x32x512xbf16> to vector<32x512xbf16>
    %cst_77 = arith.constant dense<0.000000e+00> : vector<8x512xf32>
    %168 = tpu.matmul %109, %167, %cst_77 {dimension_numbers = #tpu.dot_dimension_numbers<[1], [0], [0], [1], [0, 0, 1, 1], [], []>} : vector<8x32xbf16>, vector<32x512xbf16>, vector<8x512xf32> -> vector<8x512xf32>
    %c0_78 = arith.constant 0 : index
    %c0_79 = arith.constant 0 : index
    %c0_80 = arith.constant 0 : index
    %169 = vector.load %arg15[%c0_78, %c0_79, %c0_80] : memref<1x1x512xf32, #tpu.memory_space<vmem>>, vector<1x1x512xf32>
    %170 = vector.shape_cast %169 : vector<1x1x512xf32> to vector<1x512xf32>
    %171 = vector.broadcast %170 : vector<1x512xf32> to vector<8x512xf32>
    %172 = arith.addf %168, %171 : vector<8x512xf32>
    %cst_81 = arith.constant 0.000000e+00 : f32
    %173 = vector.broadcast %cst_81 : f32 to vector<8x512xf32>
    %174 = arith.maximumf %172, %173 : vector<8x512xf32>
    %175 = vector.shape_cast %174 : vector<8x512xf32> to vector<8x4x128xf32>
    %176 = vector.shape_cast %140 : vector<8x4xf32> to vector<8x4x1xf32>
    %177 = vector.broadcast %176 : vector<8x4x1xf32> to vector<8x4x128xf32>
    %178 = arith.mulf %175, %177 : vector<8x4x128xf32>
    %179 = vector.shape_cast %178 : vector<8x4x128xf32> to vector<8x512xf32>
    %180 = arith.truncf %179 : vector<8x512xf32> to vector<8x512xbf16>
    %c0_82 = arith.constant 0 : index
    %c0_83 = arith.constant 0 : index
    %c0_84 = arith.constant 0 : index
    %181 = vector.load %arg16[%c0_82, %c0_83, %c0_84] : memref<1x512x32xbf16, #tpu.memory_space<vmem>>, vector<1x512x32xbf16>
    %182 = vector.shape_cast %181 : vector<1x512x32xbf16> to vector<512x32xbf16>
    %cst_85 = arith.constant dense<0.000000e+00> : vector<8x32xf32>
    %183 = tpu.matmul %180, %182, %cst_85 {dimension_numbers = #tpu.dot_dimension_numbers<[1], [0], [0], [1], [0, 0, 1, 1], [], []>} : vector<8x512xbf16>, vector<512x32xbf16>, vector<8x32xf32> -> vector<8x32xf32>
    %c0_86 = arith.constant 0 : index
    %c0_87 = arith.constant 0 : index
    %c0_88 = arith.constant 0 : index
    %184 = vector.load %arg17[%c0_86, %c0_87, %c0_88] : memref<1x4x32xf32, #tpu.memory_space<vmem>>, vector<1x4x32xf32>
    %185 = vector.shape_cast %184 : vector<1x4x32xf32> to vector<4x32xf32>
    %cst_89 = arith.constant dense<0.000000e+00> : vector<8x32xf32>
    %186 = tpu.matmul %140, %185, %cst_89 {dimension_numbers = #tpu.dot_dimension_numbers<[1], [0], [0], [1], [0, 0, 1, 1], [], []>} : vector<8x4xf32>, vector<4x32xf32>, vector<8x32xf32> -> vector<8x32xf32>
    %187 = arith.addf %183, %186 : vector<8x32xf32>
    %188 = arith.addf %82, %187 : vector<8x32xf32>
    %c0_90 = arith.constant 0 : index
    %c0_91 = arith.constant 0 : index
    %189 = vector.load %arg25[%c0_90, %c0_91] : memref<8x32xf32, #tpu.memory_space<vmem>>, vector<8x32xf32>
    tpu.vector_store %arg25[%c0_90, %c0_91], %188 {strides = array<i32>} : memref<8x32xf32, #tpu.memory_space<vmem>>, vector<8x32xf32>,
    %c1_i32 = arith.constant 1 : i32
    %190 = arith.cmpi eq, %arg1, %c1_i32 : i32
    %191 = arith.extui %190 : i1 to i32
    %c0_i32_92 = arith.constant 0 : i32
    %192 = arith.cmpi ne, %191, %c0_i32_92 : i32
    scf.if %192 {
      %c0_93 = arith.constant 0 : index
      %c0_94 = arith.constant 0 : index
      %193 = vector.load %arg18[%c0_93, %c0_94] : memref<1x32xf32, #tpu.memory_space<vmem>>, vector<1x32xf32>
      %c0_95 = arith.constant 0 : index
      %c0_96 = arith.constant 0 : index
      %194 = vector.load %arg19[%c0_95, %c0_96] : memref<1x32xf32, #tpu.memory_space<vmem>>, vector<1x32xf32>
      %cst_97 = arith.constant dense<0.000000e+00> : vector<8xf32>
      %195 = vector.multi_reduction <add>, %188, %cst_97 [1] : vector<8x32xf32> to vector<8xf32>
      %196 = vector.shape_cast %195 : vector<8xf32> to vector<8x1xf32>
      %cst_98 = arith.constant 3.200000e+01 : f32
      %197 = vector.broadcast %cst_98 : f32 to vector<8x1xf32>
      %198 = arith.divf %196, %197 : vector<8x1xf32>
      %199 = vector.broadcast %198 : vector<8x1xf32> to vector<8x32xf32>
      %200 = arith.subf %188, %199 : vector<8x32xf32>
      %201 = arith.mulf %200, %200 : vector<8x32xf32>
      %cst_99 = arith.constant dense<0.000000e+00> : vector<8xf32>
      %202 = vector.multi_reduction <add>, %201, %cst_99 [1] : vector<8x32xf32> to vector<8xf32>
      %203 = vector.shape_cast %202 : vector<8xf32> to vector<8x1xf32>
      %cst_100 = arith.constant 3.200000e+01 : f32
      %204 = vector.broadcast %cst_100 : f32 to vector<8x1xf32>
      %205 = arith.divf %203, %204 : vector<8x1xf32>
      %206 = vector.broadcast %198 : vector<8x1xf32> to vector<8x32xf32>
      %207 = arith.subf %188, %206 : vector<8x32xf32>
      %cst_101 = arith.constant 9.99999974E-6 : f32
      %208 = vector.broadcast %cst_101 : f32 to vector<8x1xf32>
      %209 = arith.addf %205, %208 : vector<8x1xf32>
      %210 = math.rsqrt %209 : vector<8x1xf32>
      %211 = vector.broadcast %210 : vector<8x1xf32> to vector<8x32xf32>
      %212 = arith.mulf %207, %211 : vector<8x32xf32>
      %213 = vector.broadcast %193 : vector<1x32xf32> to vector<8x32xf32>
      %214 = arith.mulf %212, %213 : vector<8x32xf32>
      %215 = vector.broadcast %194 : vector<1x32xf32> to vector<8x32xf32>
      %216 = arith.addf %214, %215 : vector<8x32xf32>
      %217 = arith.truncf %216 : vector<8x32xf32> to vector<8x32xbf16>
      %c0_102 = arith.constant 0 : index
      %c0_103 = arith.constant 0 : index
      %218 = vector.load %arg20[%c0_102, %c0_103] : memref<32x128xbf16, #tpu.memory_space<vmem>>, vector<32x128xbf16>
      %cst_104 = arith.constant dense<0.000000e+00> : vector<8x128xf32>
      %219 = tpu.matmul %217, %218, %cst_104 {dimension_numbers = #tpu.dot_dimension_numbers<[1], [0], [0], [1], [0, 0, 1, 1], [], []>} : vector<8x32xbf16>, vector<32x128xbf16>, vector<8x128xf32> -> vector<8x128xf32>
      %c0_105 = arith.constant 0 : index
      %c0_106 = arith.constant 0 : index
      %220 = vector.load %arg21[%c0_105, %c0_106] : memref<1x128xf32, #tpu.memory_space<vmem>>, vector<1x128xf32>
      %221 = vector.broadcast %220 : vector<1x128xf32> to vector<8x128xf32>
      %222 = arith.addf %219, %221 : vector<8x128xf32>
      %223 = arith.truncf %222 : vector<8x128xf32> to vector<8x128xbf16>
      %c0_107 = arith.constant 0 : index
      %c0_108 = arith.constant 0 : index
      %c0_109 = arith.constant 0 : index
      %224 = vector.load %arg22[%c0_107, %c0_108, %c0_109] : memref<1x8x128xbf16, #tpu.memory_space<vmem>>, vector<1x8x128xbf16>
      %225 = vector.shape_cast %224 : vector<1x8x128xbf16> to vector<8x128xbf16>
      %226 = vector.shape_cast %223 : vector<8x128xbf16> to vector<1x8x128xbf16>
      tpu.vector_store %arg22[%c0_107, %c0_108, %c0_109], %226 {strides = array<i32>} : memref<1x8x128xbf16, #tpu.memory_space<vmem>>, vector<1x8x128xbf16>,
    } else {
    }
    return
  }
  func.func @transform_0(%arg0: i32, %arg1: i32) -> (i32, i32, i32) {
    %c0_i32 = arith.constant 0 : i32
    %c0_i32_0 = arith.constant 0 : i32
    %c0_i32_1 = arith.constant 0 : i32
    return %arg0, %c0_i32, %c0_i32_0 : i32, i32, i32
  }
  func.func @transform_1(%arg0: i32, %arg1: i32) -> (i32, i32, i32) {
    %c0_i32 = arith.constant 0 : i32
    %c0_i32_0 = arith.constant 0 : i32
    %c0_i32_1 = arith.constant 0 : i32
    return %arg1, %c0_i32, %c0_i32_0 : i32, i32, i32
  }
  func.func @transform_2(%arg0: i32, %arg1: i32) -> (i32, i32, i32) {
    %c0_i32 = arith.constant 0 : i32
    %c0_i32_0 = arith.constant 0 : i32
    %c0_i32_1 = arith.constant 0 : i32
    return %arg1, %c0_i32, %c0_i32_0 : i32, i32, i32
  }
  func.func @transform_3(%arg0: i32, %arg1: i32) -> (i32, i32, i32) {
    %c0_i32 = arith.constant 0 : i32
    %c0_i32_0 = arith.constant 0 : i32
    %c0_i32_1 = arith.constant 0 : i32
    return %arg1, %c0_i32, %c0_i32_0 : i32, i32, i32
  }
  func.func @transform_4(%arg0: i32, %arg1: i32) -> (i32, i32, i32) {
    %c0_i32 = arith.constant 0 : i32
    %c0_i32_0 = arith.constant 0 : i32
    %c0_i32_1 = arith.constant 0 : i32
    return %arg1, %c0_i32, %c0_i32_0 : i32, i32, i32
  }
  func.func @transform_5(%arg0: i32, %arg1: i32) -> (i32, i32, i32) {
    %c0_i32 = arith.constant 0 : i32
    %c0_i32_0 = arith.constant 0 : i32
    %c0_i32_1 = arith.constant 0 : i32
    return %arg1, %c0_i32, %c0_i32_0 : i32, i32, i32
  }
  func.func @transform_6(%arg0: i32, %arg1: i32) -> (i32, i32, i32) {
    %c0_i32 = arith.constant 0 : i32
    %c0_i32_0 = arith.constant 0 : i32
    %c0_i32_1 = arith.constant 0 : i32
    return %arg1, %c0_i32, %c0_i32_0 : i32, i32, i32
  }
  func.func @transform_7(%arg0: i32, %arg1: i32) -> (i32, i32, i32) {
    %c0_i32 = arith.constant 0 : i32
    %c0_i32_0 = arith.constant 0 : i32
    %c0_i32_1 = arith.constant 0 : i32
    return %arg1, %c0_i32, %c0_i32_0 : i32, i32, i32
  }
  func.func @transform_8(%arg0: i32, %arg1: i32) -> (i32, i32, i32) {
    %c0_i32 = arith.constant 0 : i32
    %c0_i32_0 = arith.constant 0 : i32
    %c0_i32_1 = arith.constant 0 : i32
    return %arg1, %c0_i32, %c0_i32_0 : i32, i32, i32
  }
  func.func @transform_9(%arg0: i32, %arg1: i32) -> (i32, i32, i32) {
    %c0_i32 = arith.constant 0 : i32
    %c0_i32_0 = arith.constant 0 : i32
    %c0_i32_1 = arith.constant 0 : i32
    return %arg1, %c0_i32, %c0_i32_0 : i32, i32, i32
  }
  func.func @transform_10(%arg0: i32, %arg1: i32) -> (i32, i32, i32) {
    %c0_i32 = arith.constant 0 : i32
    %c0_i32_0 = arith.constant 0 : i32
    %c0_i32_1 = arith.constant 0 : i32
    return %arg1, %c0_i32, %c0_i32_0 : i32, i32, i32
  }
  func.func @transform_11(%arg0: i32, %arg1: i32) -> (i32, i32, i32) {
    %c0_i32 = arith.constant 0 : i32
    %c0_i32_0 = arith.constant 0 : i32
    %c0_i32_1 = arith.constant 0 : i32
    return %arg1, %c0_i32, %c0_i32_0 : i32, i32, i32
  }
  func.func @transform_12(%arg0: i32, %arg1: i32) -> (i32, i32, i32) {
    %c0_i32 = arith.constant 0 : i32
    %c0_i32_0 = arith.constant 0 : i32
    %c0_i32_1 = arith.constant 0 : i32
    return %arg1, %c0_i32, %c0_i32_0 : i32, i32, i32
  }
  func.func @transform_13(%arg0: i32, %arg1: i32) -> (i32, i32, i32) {
    %c0_i32 = arith.constant 0 : i32
    %c0_i32_0 = arith.constant 0 : i32
    %c0_i32_1 = arith.constant 0 : i32
    return %arg1, %c0_i32, %c0_i32_0 : i32, i32, i32
  }
  func.func @transform_14(%arg0: i32, %arg1: i32) -> (i32, i32, i32) {
    %c0_i32 = arith.constant 0 : i32
    %c0_i32_0 = arith.constant 0 : i32
    %c0_i32_1 = arith.constant 0 : i32
    return %arg1, %c0_i32, %c0_i32_0 : i32, i32, i32
  }
  func.func @transform_15(%arg0: i32, %arg1: i32) -> (i32, i32, i32) {
    %c0_i32 = arith.constant 0 : i32
    %c0_i32_0 = arith.constant 0 : i32
    %c0_i32_1 = arith.constant 0 : i32
    return %arg1, %c0_i32, %c0_i32_0 : i32, i32, i32
  }
  func.func @transform_16(%arg0: i32, %arg1: i32) -> (i32, i32) {
    %c0_i32 = arith.constant 0 : i32
    %c0_i32_0 = arith.constant 0 : i32
    %c0_i32_1 = arith.constant 0 : i32
    return %c0_i32, %c0_i32_0 : i32, i32
  }
  func.func @transform_17(%arg0: i32, %arg1: i32) -> (i32, i32) {
    %c0_i32 = arith.constant 0 : i32
    %c0_i32_0 = arith.constant 0 : i32
    %c0_i32_1 = arith.constant 0 : i32
    return %c0_i32, %c0_i32_0 : i32, i32
  }
  func.func @transform_18(%arg0: i32, %arg1: i32) -> (i32, i32) {
    %c0_i32 = arith.constant 0 : i32
    %c0_i32_0 = arith.constant 0 : i32
    %c0_i32_1 = arith.constant 0 : i32
    return %c0_i32, %c0_i32_0 : i32, i32
  }
  func.func @transform_19(%arg0: i32, %arg1: i32) -> (i32, i32) {
    %c0_i32 = arith.constant 0 : i32
    %c0_i32_0 = arith.constant 0 : i32
    %c0_i32_1 = arith.constant 0 : i32
    return %c0_i32, %c0_i32_0 : i32, i32
  }
  func.func @transform_20(%arg0: i32, %arg1: i32) -> (i32, i32, i32) {
    %c0_i32 = arith.constant 0 : i32
    %c0_i32_0 = arith.constant 0 : i32
    %c0_i32_1 = arith.constant 0 : i32
    return %arg0, %c0_i32, %c0_i32_0 : i32, i32, i32
  }
  func.func @transform_21(%arg0: i32, %arg1: i32) -> (i32, i32, i32) {
    %c0_i32 = arith.constant 0 : i32
    %c0_i32_0 = arith.constant 0 : i32
    %c0_i32_1 = arith.constant 0 : i32
    return %arg0, %c0_i32, %c0_i32_0 : i32, i32, i32
  }
  func.func @transform_22(%arg0: i32, %arg1: i32) -> (i32, i32, i32) {
    %c0_i32 = arith.constant 0 : i32
    %c0_i32_0 = arith.constant 0 : i32
    %c0_i32_1 = arith.constant 0 : i32
    return %arg0, %c0_i32, %c0_i32_0 : i32, i32, i32
  }
}

</mosaic_0001>

<bundles_post_ra>
// kernel: tpu_custom_call.1
= control target key start
LH: loop header
LB: loop body
LE: loop exit
PB: predicated region body
PF: predicated region fallthrough
CT: control target
= control target key end

     0   :  { %s4510_s0 = inlined_call_operand.vmem [shape: f32[2,8,32], index: 0, kind: input, shape index: {}]   ;;  %s4511_s1 = inlined_call_operand.vmem [shape: f32[2,1,32], index: 1, kind: input, shape index: {}]   ;;  %s4512_s2 = inlined_call_operand.vmem [shape: f32[2,1,32], index: 2, kind: input, shape index: {}]   ;;  %s4513_s3 = inlined_call_operand.vmem [shape: bf16[2,32,32], index: 3, kind: input, shape index: {}]   ;;  %s4514_s4 = inlined_call_operand.vmem [shape: bf16[2,32,32], index: 4, kind: input, shape index: {}]   ;;  %s4515_s5 = inlined_call_operand.vmem [shape: bf16[2,32,32], index: 5, kind: input, shape index: {}]   ;;  %s4516_s6 = inlined_call_operand.vmem [shape: bf16[2,32,32], index: 6, kind: input, shape index: {}]   ;;  %s4517_s7 = inlined_call_operand.vmem [shape: f32[2,1,32], index: 7, kind: input, shape index: {}]   ;;  %s4518_s8 = inlined_call_operand.vmem [shape: f32[2,1,32], index: 8, kind: input, shape index: {}]   ;;  %s4519_s9 = inlined_call_operand.vmem [shape: f32[2,1,32], index: 9, kind: input, shape index: {}]   ;;  %s4520_s10 = inlined_call_operand.vmem [shape: bf16[2,32,4], index: 10, kind: input, shape index: {}]   ;;  %s4521_s11 = inlined_call_operand.vmem [shape: f32[2,1,4], index: 11, kind: input, shape index: {}]   ;;  %s4522_s12 = inlined_call_operand.vmem [shape: bf16[2,32,512], index: 12, kind: input, shape index: {}]   ;;  %s4523_s13 = inlined_call_operand.vmem [shape: f32[2,1,512], index: 13, kind: input, shape index: {}]   ;;  %s4524_s14 = inlined_call_operand.vmem [shape: bf16[2,512,32], index: 14, kind: input, shape index: {}]   ;;  %s4525_s15 = inlined_call_operand.vmem [shape: f32[2,4,32], index: 15, kind: input, shape index: {}]   ;;  %s4526_s16 = inlined_call_operand.vmem [shape: f32[1,32], index: 16, kind: input, shape index: {}]   ;;  %s4527_s17 = inlined_call_operand.vmem [shape: f32[1,32], index: 17, kind: input, shape index: {}]   ;;  %s4528_s18 = inlined_call_operand.vmem [shape: bf16[32,128], index: 18, kind: input, shape index: {}]   ;;  %s4529_s19 = inlined_call_operand.vmem [shape: f32[1,128], index: 19, kind: input, shape index: {}]   ;;  %s4530_s20 = inlined_call_operand.hbm [shape: bf16[2,8,128], index: 20, kind: output, shape index: {0}]   ;;  %s4531_s21 = inlined_call_operand.hbm [shape: f32[2,2,4], index: 21, kind: output, shape index: {1}]   ;;  %s4532_s22 = inlined_call_operand.hbm [shape: f32[2,2,4], index: 22, kind: output, shape index: {2}]  }
   0x1   :  { %4558 = sst [smem:[#allocation26_spill]] %s4510_s0 }
   0x2   :  { %4559 = sst [smem:[#allocation27_spill]] %s4511_s1 }
   0x3   :  { %4560 = sst [smem:[#allocation28_spill]] %s4512_s2 }
   0x4   :  { %4561 = sst [smem:[#allocation29_spill]] %s4513_s3 }
   0x5   :  { %4562 = sst [smem:[#allocation30_spill]] %s4514_s4 }
   0x6   :  { %4563 = sst [smem:[#allocation31_spill]] %s4515_s5 }
   0x7   :  { %4564 = sst [smem:[#allocation32_spill]] %s4516_s6 }
   0x8   :  { %4565 = sst [smem:[#allocation33_spill]] %s4517_s7 }
   0x9   :  { %4566 = sst [smem:[#allocation34_spill]] %s4518_s8 }
   0xa   :  { %4567 = sst [smem:[#allocation35_spill]] %s4525_s15 }
   0xb   :  { %4568 = sst [smem:[#allocation36_spill]] %s4526_s16 }
   0xc   :  { %4569 = sst [smem:[#allocation37_spill]] %s4527_s17 }
   0xd   :  { %4570 = sst [smem:[#allocation38_spill]] %s4528_s18 }
   0xe   :  { %4571 = sst [smem:[#allocation39_spill]] %s4529_s19 }
   0xf   :  { %4572 = sst [smem:[#allocation40_spill]] %s4530_s20 }
  0x10   :  { %4573 = sst [smem:[#allocation41_spill]] %s4531_s21 }
  0x11   :  { %4574 = sst [smem:[#allocation42_spill]] %s4532_s22 }
  0x12   :  { %28 = vsyncpa [#allocation4], 0 }
  0x13   :  { %30 = vsyncpa [#allocation4 + $0x1], 0 }
  0x14   :  { %31 = vsyncpa [#allocation6], 0 }
  0x15   :  { %33 = vsyncpa [#allocation6 + $0x1], 0  ;;  %s3803_s3 = smov 0   ;;  %s3805_s28 = smov 0  }
  0x16   :  { %s3807_s29 = smov 0   ;;  %s3809_s30 = smov 0  }
  0x17   :  { %s3811_s4 = smov 0   ;;  %s3813_s0 = smov 0  }
  0x18   :  { %s3815_s23 = smov 0   ;;  %s3817_s1 = smov 0  }
  0x19 LB: > { %4575 = sst [smem:[#allocation10_spill]] %s3647_s3  ;;  %s4533_s5 = sadd.s32 4294967295, %s3675_s1   ;;  %s3675_s1 = sphi %s3817_s1, %s39_s1   ;;  %s3671_s23 = sphi %s3815_s23, %s4639_s23   ;;  %s3667_s0 = sphi %s3813_s0, %s4638_s0   ;;  %s3663_s4 = sphi %s3811_s4, %s4637_s4   ;;  %s3659_s30 = sphi %s3809_s30, %s4636_s30   ;;  %s3655_s29 = sphi %s3807_s29, %s4635_s29   ;;  %s3651_s28 = sphi %s3805_s28, %s4634_s28   ;;  %s3647_s3 = sphi %s3803_s3, %s4633_s3  }
  0x1a   : > { %4576 = sst [smem:[#allocation11_spill]] %s3651_s28  ;;  %s4534_s24 = sadd.s32 4294967294, %s3675_s1  }
  0x1b   : > { %4577 = sst [smem:[#allocation12_spill]] %s3655_s29  ;;  %s48_s6 = sadd.s32 1, %s3667_s0 }
  0x1c   : > { %4578 = sst [smem:[#allocation13_spill]] %s3659_s30  ;;  %p49_p0 = scmp.ge.s32.totalorder %s48_s6, 2 }
  0x1d   : > { %4579 = sst [smem:[#allocation14_spill]] %s3663_s4  ;;  %s51_s25 = sadd.s32 1, %s3671_s23 }
  0x1e   : > { %4580 = sst [smem:[#allocation15_spill]] %s3667_s0  ;;  %p568_p1 = scmp.ne.s32.totalorder %s3655_s29, %s3651_s28 }
  0x1f   : > { %4581 = sst [smem:[#allocation16_spill]] %s3671_s23  ;;  %p569_p2 = scmp.eq.s32.totalorder %s4533_s5, 3 }
  0x20   : > { %4582 = sst [smem:[#allocation17_spill]] %s3675_s1  ;;  %s4641_s6 = smov (%p49_p0, %s48_s6), 0 }
  0x21   : > { %4583 = sst [smem:[#allocation18_spill]] %s4641_s6  ;;  %s4643_s25 = smov (!%p49_p0, %s51_s25), %s3671_s23 }
  0x22   : > { %p3854_p3 = por %p569_p2, %p568_p1  ;;  %p574_p4 = scmp.ne.s32.totalorder %s3651_s28, %s3647_s3 }
  0x23   : > { %p53_p5 = scmp.ge.s32.totalorder %s4643_s25, 2  ;;  %p575_p6 = scmp.eq.s32.totalorder %s4534_s24, 3 }
  0x24   : > { %s4584_s26 = scalar_select %p3854_p3, 1, 0 }
  0x25   : > { %p3069_p7 = scmp.ge.s32.totalorder %s3675_s1, 1  ;;  %p770_p8 = scmp.lt.s32.totalorder %s3675_s1, 5 }
  0x26   : > { %4585 = sst [smem:[#allocation19_spill]] %s4584_s26  ;;  %s4645_s25 = smov (%p53_p5, %s4643_s25), 0 }
  0x27   : > { %4586 = sst [smem:[#allocation20_spill]] %s4645_s25  ;;  %p3866_p9 = por %p575_p6, %p574_p4 }
  0x28   : > { %p771_p10 = pnand %p3069_p7, %p770_p8  ;;  %s555_s27 = ssub.s32 %s3671_s23, %s4645_s25 }
  0x29   : > { %s4587_s2 = scalar_select %p3866_p9, 1, 0 }
  0x2a   : > { %s558_s5 = sadd.s32 1, %s3655_s29  ;;  %p556_p11 = scmp.eq.s32.totalorder %s555_s27, 0 }
  0x2b   : > { %4588 = sst [smem:[#allocation21_spill]] %s4587_s2  ;;  %774 = sbr.rel (%p771_p10) target bundleno = 3222 (0xc96), region = 100 }
  0x2c   : > { %s3874_s6 = scalar_select %p556_p11, %s3655_s29, %s558_s5  }
  0x2e   : > { %4589 = sst [smem:[#allocation22_spill]] %s3874_s6 }
  0x30   : > { %s3877_s24 = sand.u32 1, %s3651_s28   ;;  %p902_p12 = scmp.lt.s32.totalorder %s3663_s4, 1 }
  0x31   : > { %4590 = sst [smem:[#allocation23_spill]] %s3877_s24  ;;  %s3070_s0 = sshll.u32 %s3877_s24, 2 }
  0x32   : > { %s3071_s3 = sshll.u32 %s3877_s24, 1  ;;  %p906_p13 = scmp.lt.s32.totalorder %s3659_s30, 1 }
  0x33   : > { %s903_s2 = scalar_select %p902_p12, %s3663_s4, 1 }
  0x34   : > { %s3885_s25 = scalar_select %p906_p13, %s3659_s30, 1 }
  0x35   : > { %s3073_s5 = sshll.u32 %s903_s2, 3  ;;  %s4591_s6 = sld [smem:[#allocation26_spill]] }
  0x36   : > { %s3330_s19 = sshll.u32 %s3885_s25, 4  ;;  %s4594_s18 = sld [smem:[#allocation29_spill]] }
  0x37   : > { %s4595_s23 = sld [smem:[#allocation30_spill]]  ;;  %s3086_s17 = sshll.u32 %s3885_s25, 2 }
  0x38   : > { %s4597_s22 = sld [smem:[#allocation31_spill]]  ;;  %s3950_s2 = scalar_lea.vmem %s4523_s13, %s3086_s17 }
  0x39   : > { %s4598_s26 = sld [smem:[#allocation32_spill]]  ;;  %s3963_s1 = scalar_lea.vmem [#allocation3], %s3070_s0 }
  0x3a   : > { %s3967_s24 = scalar_lea.vmem [#allocation7], %s3071_s3  ;;  %s4603_s15 = sld [smem:[#allocation13_spill]] }
  0x3b   : > { %s905_s29 = scalar_lea.vmem %s4591_s6, %s3073_s5 }
  0x3c   : > { %s3902_s30 = scalar_lea.vmem %s4594_s18, %s3330_s19 }
  0x3d   : > { %s3907_s27 = scalar_lea.vmem %s4595_s23, %s3330_s19  ;;  %s3336_s23 = sshll.u32 %s3885_s25, 8 }
  0x3e   : > { %4596 = sst [smem:[#allocation24_spill]] %s3907_s27  ;;  %s3912_s20 = scalar_lea.vmem %s4597_s22, %s3330_s19 }
  0x3f   : > { %s3917_s4 = scalar_lea.vmem %s4598_s26, %s3330_s19  ;;  %s3934_s22 = scalar_lea.vmem %s4520_s10, %s3330_s19 }
  0x40   : > { %4599 = sst [smem:[#allocation25_spill]] %s3917_s4  ;;  %s3335_s4 = sshll.u32 %s3885_s25, 6 }
  0x41   : > { %s3944_s16 = scalar_lea.vmem %s4522_s12, %s3335_s4  ;;  %s3956_s5 = scalar_lea.vmem %s4524_s14, %s3336_s23 }
  0x42   : > { %s4602_s26 = sld [smem:[#allocation35_spill]]  ;;  %s3965_s4 = scalar_lea.vmem [#allocation5], %s3071_s3 }
  0x43   : > { %p3090_p0 = scmp.ne.s32.totalorder %s4603_s15, 0 }
  0x45   : > { %971 = sbr.rel (%p3090_p0) target bundleno = 78 (0x4e), region = 104 }
  0x48   : > { %s3961_s27 = scalar_lea.vmem %s4602_s26, %s3086_s17 }
  0x4a   : > { %v972_v0 = vld [vmem:[%s905_s29] sm:$0xff]  ;;  %vm973_vm0 = vcmask 261120   ;;  %vm975_vm1 = vcmask 25600   ;;  %v3677_v1 = vmov 0.0  }
  0x4b   : > { %974 = vst.msk [vmem:[#allocation2] sm:$0xff] %vm973_vm0, %v972_v0 }
  0x4c   : > { %976 = vst.msk [vmem:[%s3965_s4] sm:$0x3] %vm975_vm1, %v3677_v1 }
  0x4d   : > { %977 = vst.msk [vmem:[%s3967_s24] sm:$0x3] %vm975_vm1, %v3677_v1 }
  0x4e PF: > { %vm986_vm2 = vcmask 261120   ;;  %v3678_v4 = vmov 32.0   ;;  %s4604_s3 = sld [smem:[#allocation24_spill]]  ;;  %v3338_v16 = vld [vmem:[%s3902_s30 + $0x8] sm:$0xff]  ;;  %v3337_v19 = vld [vmem:[%s3902_s30] sm:$0xff]  ;;  %s3679_s6 = smov 104  }
  0x4f   : > { %3490 = vrcp.f32 %v3678_v4  ;;  %v3342_v18 = vld [vmem:[%s3912_s20 + $0x8] sm:$0xff]  ;;  %1050 = vmatpush.bf16.msra.mxu0 %v3338_v16  ;;  %v3341_v21 = vld [vmem:[%s3912_s20] sm:$0xff]  ;;  %s4605_s0 = sld [smem:[#allocation27_spill]]  ;;  %s3680_s19 = smov 120   ;;  %v3682_v45 = vmov 1983009808  }
  0x50   : > { %1349 = vmatpush.bf16.msra.mxu2 %v3342_v18  ;;  %s4607_s18 = sld [smem:[#allocation28_spill]]  ;;  %s3681_s28 = smov 112   ;;  %v1073_v46 = vunpack.c.l.s4 %v3682_v45  ;;  %vm1068_vm7 = vcmask 1047556   ;;  %v3683_v54 = vmov 1934713408   ;;  %vm1484_vm8 = vcmask 64512  }
  0x51   : > { %v1097_v55 = vunpack.c.l.s4 %v3683_v54  ;;  %vm1626_vm10 = vcmask 1043456   ;;  %s4609_s21 = sld [smem:[#allocation25_spill]]  ;;  %s3684_s15 = smov 24   ;;  %vm1823_vm11 = vcmask 130048   ;;  %vm1825_vm12 = vcmask 195584  }
  0x52   : > { %v3972_v2 = vld [vmem:[#allocation2] sm:$0xff]  ;;  %v4010_v51 = vunpack.c.0.s8 %v1073_v46  ;;  %s3686_s29 = smov 8   ;;  %s4610_s7 = sld [smem:[#allocation33_spill]]  ;;  %vm1934_vm0 = vcmask 31744  }
  0x53   : > { %v987_v3 = vsel %vm986_vm2, %v3972_v2, 0.0  ;;  %1051 = vmatpush.bf16.msra.mxu0 %v3337_v19  ;;  %v4015_v62 = vunpack.c.0.s8 %v1097_v55  ;;  %s4612_s8 = sld [smem:[#allocation34_spill]] }
  0x54   : > { %988 = vadd.xlane.f32.xlu0 %v987_v3  ;;  %v3340_v17 = vld [vmem:[%s4604_s3 + $0x8] sm:$0xff]  ;;  %v3339_v20 = vld [vmem:[%s4604_s3] sm:$0xff]  ;;  %1350 = vmatpush.bf16.msra.mxu2 %v3341_v21  ;;  %s3685_s3 = smov 16  }
  0x55   : > { %v3491_v5 = vpop.eup %3490  ;;  %1200 = vmatpush.bf16.msra.mxu1 %v3340_v17  ;;  %s4606_s20 = scalar_lea.vmem %s4605_s0, %s3885_s25 }
  0x56   : > { %v991_v6 = vmul.f32 32.0, %v3491_v5  ;;  %vm995_vm3 = vweird.f32 %v3491_v5  ;;  %v3484_v31 = vld [vmem:[%s4606_s20] ss:$0 sm:$0xff]  ;;  %s4608_s23 = scalar_lea.vmem %s4607_s18, %s3885_s25 }
  0x57   : > { %v3485_v34 = vld [vmem:[%s4608_s23] ss:$0 sm:$0xff]  ;;  %s4614_s23 = scalar_lea.vmem %s4519_s9, %s3885_s25 }
  0x58   : > { %v992_v7 = vsub.f32 1.0, %v991_v6  ;;  %s4611_s20 = scalar_lea.vmem %s4610_s7, %s3885_s25 }
  0x59   : > { %1201 = vmatpush.bf16.msra.mxu1 %v3339_v20 }
  0x5a   : > { %v993_v8 = vmul.f32 %v3491_v5, %v992_v7 }
  0x5c   : > { %v994_v9 = vadd.f32 %v3491_v5, %v993_v8 }
  0x5e   : > { %v3976_v10 = vsel %vm995_vm3, %v3491_v5, %v994_v9 }
  0xc7   : > { %v989_v11 = vpop.xlane.xlu0 %988 }
  0xc8   : > { %v997_v12 = vmul.f32 %v3976_v10, %v989_v11 }
  0xca   : > { %v998_v13 = vsub.f32 %v3972_v2, %v997_v12 }
  0xcc   : > { %v999_v14 = vmul.f32 %v998_v13, %v998_v13 }
  0xce   : > { %v1000_v15 = vsel %vm986_vm2, %v999_v14, 0.0 }
  0xcf   : > { %1001 = vadd.xlane.f32.xlu0 %v1000_v15 }
 0x142   : > { %v1002_v22 = vpop.xlane.xlu0 %1001 }
 0x143   : > { %v1003_v23 = vmul.f32 %v1002_v22, %v3976_v10 }
 0x145   : > { %v1004_v24 = vadd.f32 1e-05, %v1003_v23 }
 0x147   : > { %3492 = vrsqrt.f32 %v1004_v24  ;;  %vm1011_vm5 = vweird.f32 %v1004_v24 }
 0x14d   : > { %v3493_v25 = vpop.eup %3492 }
 0x14e   : > { %v1006_v26 = vmul.f32 %v3493_v25, %v1004_v24  ;;  %vm1012_vm4 = vweird.f32 %v3493_v25 }
 0x14f   : > { %vm1013_vm6 = vmor %vm1011_vm5, %vm1012_vm4 }
 0x150   : > { %v1007_v27 = vmul.f32 %v3493_v25, %v1006_v26 }
 0x152   : > { %v1008_v28 = vmul.f32 0.5, %v1007_v27 }
 0x154   : > { %v1009_v29 = vsub.f32 1.5, %v1008_v28 }
 0x156   : > { %v1010_v30 = vmul.f32 %v3493_v25, %v1009_v29 }
 0x158   : > { %v1014_v32 = vsel %vm1013_vm6, %v3493_v25, %v1010_v30 }
 0x159   : > { %v1015_v33 = vmul.f32 %v1014_v32, %v998_v13 }
 0x15b   : > { %v1019_v35 = vmul.f32 %v3484_v31, %v1015_v33 }
 0x15d   : > { %v1023_v36 = vadd.f32 %v3485_v34, %v1019_v35 }
 0x15f   : > { %v1024_v37 = vpack.c.bf16 %v1023_v36, %v1023_v36 }
 0x161   : > { %3099 = vmatmul.msk.bf16.vlgmr.msra.gmra.mxu0 %vm986_vm2, %v1024_v37  ;;  %3108 = vmatmul.msk.bf16.vlgmr.msra.gmra.mxu1 %vm986_vm2, %v1024_v37 }
 0x162   : > { %3117 = vmatmul.msk.bf16.vlgmr.msra.gmra.mxu2 %vm986_vm2, %v1024_v37 }
 0x1de   : > { %v1053_v38 = vpop.f32.mrf.mxu0  ;;  %v1203_v39 = vpop.f32.mrf.mxu1 }
 0x1df   : > { %1214 = vrot.lane.b32.xlu2 %v1203_v39, %s3679_s6  ;;  %1208 = vrot.lane.b32.xlu1 %v1203_v39, %s3680_s19  ;;  %v1219_v58 = vrot.slane %v1203_v39, 4  ;;  %v1070_v60 = vrot.slane %v1053_v38, 4 }
 0x1e0   : > { %1061 = vrot.lane.b32.xlu0 %v1053_v38, %s3681_s28 }
 0x1e5   : > { %v4004_v40 = vpop.f32.mrf.mxu2 }
 0x1e6   : > { %v1055_v41 = vpop.f32.mrf.mxu0  ;;  %v1205_v42 = vpop.f32.mrf.mxu1 }
 0x1e7   : > { %1211 = vrot.lane.b32.xlu1 %v1203_v39, %s3681_s28  ;;  %1058 = vrot.lane.b32.xlu2 %v1053_v38, %s3680_s19 }
 0x1ed   : > { %v1354_v43 = vpop.f32.mrf.mxu2 }
 0x1ef   : > { %1064 = vrot.lane.b32.xlu1 %v1053_v38, %s3679_s6 }
 0x239   : > { %v1215_v44 = vpop.permute.xlu2 %1214 }
 0x23a   : > { %v1229_v49 = vrot.slane %v1215_v44, 4 }
 0x241   : > { %v1059_v12 = vpop.permute.xlu2 %1058 }
 0x242   : > { %v1082_v22 = vrot.slane %v1059_v12, 4 }
 0x251   : > { %v1209_v47 = vpop.permute.xlu1 %1208 }
 0x252   : > { %v1231_v48 = vrot.slane %v1209_v47, 4  ;;  %v1062_v52 = vpop.permute.xlu0 %1061  ;;  %v1230_v53 = vsel %vm1068_vm7, %v1229_v49, %v1209_v47 }
 0x253   : > { %v1067_v57 = vrot.slane %v1062_v52, 4  ;;  %v1236_v59 = vperm.slane %v1230_v53, %v4010_v51  ;;  %v1071_v3 = vsel %vm1068_vm7, %v1062_v52, %v1070_v60 }
 0x254   : > { %v1232_v50 = vsel %vm1068_vm7, %v1215_v44, %v1231_v48  ;;  %v1079_v13 = vperm.slane %v1071_v3, %v4010_v51 }
 0x255   : > { %v1240_v56 = vperm.slane %v1232_v50, %v4010_v51  ;;  %v1069_v5 = vsel %vm1068_vm7, %v1067_v57, %v1053_v38  ;;  %v1241_v7 = vrot.slane %v1236_v59, 4 }
 0x256   : > { %v1075_v15 = vperm.slane %v1069_v5, %v4010_v51  ;;  %v1106_v25 = vrot.slane %v1079_v13, 4 }
 0x257   : > { %v1253_v1 = vrot.slane %v1240_v56, 4 }
 0x258   : > { %v1094_v29 = vrot.slane %v1075_v15, 4 }
 0x259   : > { %v1212_v61 = vpop.permute.xlu1 %1211 }
 0x25a   : > { %v1217_v63 = vrot.slane %v1212_v61, 4  ;;  %v1220_v0 = vsel %vm1068_vm7, %v1212_v61, %v1219_v58 }
 0x25b   : > { %v1228_v4 = vperm.slane %v1220_v0, %v4010_v51 }
 0x25c   : > { %v1218_v6 = vsel %vm1068_vm7, %v1217_v63, %v1203_v39 }
 0x25d   : > { %v1224_v8 = vperm.slane %v1218_v6, %v4010_v51  ;;  %v1254_v9 = vsel %vm1068_vm7, %v1253_v1, %v1228_v4  ;;  %v1255_v11 = vrot.slane %v1228_v4, 4 }
 0x25e   : > { %v1260_v14 = vperm.slane %v1254_v9, %v4015_v62 }
 0x25f   : > { %v1242_v16 = vsel %vm1068_vm7, %v1241_v7, %v1224_v8  ;;  %v1243_v17 = vrot.slane %v1224_v8, 4  ;;  %v1256_v18 = vsel %vm1068_vm7, %v1240_v56, %v1255_v11 }
 0x260   : > { %v1248_v19 = vperm.slane %v1242_v16, %v4015_v62  ;;  %v1264_v20 = vperm.slane %v1256_v18, %v4015_v62  ;;  %v1269_v21 = vrot.slane %v1260_v14, 4 }
 0x261   : > { %v1244_v23 = vsel %vm1068_vm7, %v1236_v59, %v1243_v17  ;;  %v1065_v24 = vpop.permute.xlu1 %1064 }
 0x262   : > { %v1252_v26 = vperm.slane %v1244_v23, %v4015_v62  ;;  %v1265_v27 = vrot.slane %v1248_v19, 4  ;;  %v1271_v28 = vrot.slane %v1264_v20, 4  ;;  %v1270_v30 = vsel %vm1068_vm7, 0.0, %v1269_v21 }
 0x263   : > { %v1080_v31 = vrot.slane %v1065_v24, 4  ;;  %v1083_v32 = vsel %vm1068_vm7, %v1065_v24, %v1082_v22 }
 0x264   : > { %v1267_v33 = vrot.slane %v1252_v26, 4  ;;  %v1272_v34 = vsel %vm1068_vm7, 0.0, %v1271_v28  ;;  %v1284_v35 = vsel %vm1068_vm7, %v1271_v28, %v1260_v14  ;;  %v1091_v36 = vperm.slane %v1083_v32, %v4010_v51 }
 0x265   : > { %v1288_v37 = vperm.slane %v1284_v35, %v4010_v51  ;;  %v1289_v38 = vrot.slane %v1272_v34, 4  ;;  %v1081_v39 = vsel %vm1068_vm7, %v1080_v31, %v1059_v12  ;;  %v1266_v41 = vsel %vm1068_vm7, 0.0, %v1265_v27 }
 0x266   : > { %v1268_v42 = vsel %vm1068_vm7, 0.0, %v1267_v33  ;;  %v1087_v43 = vperm.slane %v1081_v39, %v4010_v51  ;;  %v1104_v44 = vrot.slane %v1091_v36, 4  ;;  %v1107_v45 = vsel %vm1068_vm7, %v1091_v36, %v1106_v25 }
 0x267   : > { %v1278_v46 = vrot.slane %v1268_v42, 4  ;;  %v1290_v47 = vsel %vm1068_vm7, %v1289_v38, %v1270_v30  ;;  %v1115_v48 = vperm.slane %v1107_v45, %v4015_v62  ;;  %v1273_v49 = vsel %vm1068_vm7, %v1267_v33, %v1248_v19 }
 0x268   : > { %v1092_v50 = vrot.slane %v1087_v43, 4  ;;  %v1095_v52 = vsel %vm1068_vm7, %v1087_v43, %v1094_v29  ;;  %v1105_v53 = vsel %vm1068_vm7, %v1104_v44, %v1079_v13  ;;  %v1277_v54 = vperm.slane %v1273_v49, %v4010_v51 }
 0x269   : > { %v1103_v55 = vperm.slane %v1095_v52, %v4015_v62  ;;  %v1111_v56 = vperm.slane %v1105_v53, %v4015_v62  ;;  %v1122_v57 = vrot.slane %v1115_v48, 4  ;;  %v1279_v58 = vsel %vm1068_vm7, %v1278_v46, %v1266_v41 }
 0x26a   : > { %v1093_v59 = vsel %vm1068_vm7, %v1092_v50, %v1075_v15  ;;  %v1283_v60 = vperm.slane %v1279_v58, %v4010_v51  ;;  %v1294_v61 = vperm.slane %v1290_v47, %v4010_v51  ;;  %v1297_v63 = vrot.slane %v1277_v54, 4 }
 0x26b   : > { %v1099_v0 = vperm.slane %v1093_v59, %v4015_v62  ;;  %v1118_v1 = vrot.slane %v1103_v55, 4  ;;  %v1120_v3 = vrot.slane %v1111_v56, 4  ;;  %v1123_v4 = vsel %vm1068_vm7, 0.0, %v1122_v57 }
 0x26c   : > { %v1135_v5 = vsel %vm1068_vm7, %v1122_v57, %v1111_v56  ;;  %v1140_v6 = vrot.slane %v1123_v4, 4  ;;  %v1298_v7 = vsel %vm1068_vm7, %v1283_v60, %v1297_v63  ;;  %v1309_v8 = vrot.slane %v1288_v37, 4 }
 0x26d   : > { %v1116_v9 = vrot.slane %v1099_v0, 4  ;;  %v1119_v11 = vsel %vm1068_vm7, 0.0, %v1118_v1  ;;  %v1121_v12 = vsel %vm1068_vm7, 0.0, %v1120_v3  ;;  %v1124_v13 = vsel %vm1068_vm7, %v1118_v1, %v1099_v0 }
 0x26e   : > { %v1128_v14 = vperm.slane %v1124_v13, %v4010_v51  ;;  %v1129_v15 = vrot.slane %v1119_v11, 4  ;;  %v1139_v16 = vperm.slane %v1135_v5, %v4010_v51  ;;  %v1141_v17 = vsel %vm1068_vm7, %v1140_v6, %v1121_v12 }
 0x26f   : > { %v1117_v18 = vsel %vm1068_vm7, 0.0, %v1116_v9  ;;  %v1145_v19 = vperm.slane %v1141_v17, %v4010_v51  ;;  %v1306_v20 = vperm.slane %v1298_v7, %v4015_v62  ;;  %v1310_v21 = vsel %vm1068_vm7, %v1294_v61, %v1309_v8 }
 0x270   : > { %v1160_v22 = vrot.slane %v1139_v16, 4  ;;  %v1318_v23 = vperm.slane %v1310_v21, %v4015_v62  ;;  %v1295_v24 = vrot.slane %v1283_v60, 4  ;;  %v1307_v25 = vrot.slane %v1294_v61, 4 }
 0x271   : > { %v1325_v26 = vrot.slane %v1306_v20, 4  ;;  %v1130_v27 = vsel %vm1068_vm7, %v1129_v15, %v1117_v18  ;;  %v1148_v28 = vrot.slane %v1128_v14, 4  ;;  %v1158_v29 = vrot.slane %v1145_v19, 4 }
 0x272   : > { %v1323_v30 = vrot.slane %v1318_v23, 4  ;;  %v1296_v31 = vsel %vm1068_vm7, %v1295_v24, %v1277_v54  ;;  %v1308_v32 = vsel %vm1068_vm7, %v1307_v25, %v1288_v37  ;;  %v1134_v33 = vperm.slane %v1130_v27, %v4010_v51 }
 0x273   : > { %v1302_v34 = vperm.slane %v1296_v31, %v4015_v62  ;;  %v1314_v35 = vperm.slane %v1308_v32, %v4015_v62  ;;  %v1326_v36 = vsel %vm1068_vm7, %v1318_v23, %v1325_v26  ;;  %v1161_v38 = vsel %vm1068_vm7, %v1145_v19, %v1160_v22 }
 0x274   : > { %v1324_v39 = vsel %vm1068_vm7, %v1323_v30, %v1306_v20  ;;  %v1483_v41 = vpack.c.bf16 %v1326_v36, %v1326_v36  ;;  %v1149_v42 = vsel %vm1068_vm7, %v1134_v33, %v1148_v28  ;;  %v1169_v43 = vperm.slane %v1161_v38, %v4015_v62 }
 0x275   : > { %v1482_v44 = vpack.c.bf16 %v1324_v39, %v1324_v39  ;;  %v1319_v45 = vrot.slane %v1314_v35, 4  ;;  %v1321_v37 = vrot.slane %v1302_v34, 4  ;;  %v1157_v46 = vperm.slane %v1149_v42, %v4015_v62 }
 0x276   : > { %v1546_v47 = vsel %vm1484_vm8, %v1483_v41, 0  ;;  %v1174_v48 = vrot.slane %v1169_v43, 4  ;;  %v1146_v49 = vrot.slane %v1134_v33, 4  ;;  %v1159_v50 = vsel %vm1068_vm7, %v1158_v29, %v1139_v16 }
 0x277   : > { %v1527_v52 = vsel %vm1484_vm8, %v1482_v44, 0  ;;  %v1320_v53 = vsel %vm1068_vm7, %v1319_v45, %v1302_v34  ;;  %1555 = vmatpush.bf16.xpose.msrb.mxu2 %v1546_v47  ;;  %v1322_v54 = vsel %vm1068_vm7, %v1314_v35, %v1321_v37  ;;  %v1165_v55 = vperm.slane %v1159_v50, %v4015_v62 }
 0x278   : > { %1536 = vmatpush.bf16.xpose.msrb.mxu1 %v1527_v52  ;;  %v1480_v56 = vpack.c.bf16 %v1320_v53, %v1320_v53  ;;  %v1481_v57 = vpack.c.bf16 %v1322_v54, %v1322_v54  ;;  %v1147_v58 = vsel %vm1068_vm7, %v1146_v49, %v1128_v14  ;;  %v1176_v61 = vrot.slane %v1157_v46, 4 }
 0x279   : > { %v1153_v59 = vperm.slane %v1147_v58, %v4015_v62  ;;  %v1170_v60 = vrot.slane %v1165_v55, 4  ;;  %v1175_v1 = vsel %vm1068_vm7, %v1174_v48, %v1157_v46  ;;  %v979_v12 = vlaneseq }
 0x27a   : > { %v1489_v63 = vsel %vm1484_vm8, %v1480_v56, 0  ;;  %v1508_v0 = vsel %vm1484_vm8, %v1481_v57, 0  ;;  %v1177_v4 = vsel %vm1068_vm7, %v1169_v43, %v1176_v61  ;;  %v1478_v6 = vpack.c.bf16 %v1175_v1, %v1175_v1 }
 0x27b   : > { %1498 = vmatpush.bf16.xpose.msra.mxu3 %v1489_v63  ;;  %1517 = vmatpush.bf16.xpose.msrb.mxu0 %v1508_v0  ;;  %v1172_v3 = vrot.slane %v1153_v59, 4  ;;  %v1479_v5 = vpack.c.bf16 %v1177_v4, %v1177_v4  ;;  %v1171_v7 = vsel %vm1068_vm7, %v1170_v60, %v1153_v59  ;;  %v4101_v13 = vshrl.u32 %v979_v12, 7 }
 0x27c   : > { %v1476_v9 = vpack.c.bf16 %v1171_v7, %v1171_v7  ;;  %v4106_v14 = vand.u32 127, %v979_v12  ;;  %v1368_v0 = vrot.slane %v4004_v40, 4 }
 0x27d   : > { %v1173_v8 = vsel %vm1068_vm7, %v1165_v55, %v1172_v3  ;;  %3483 = vset.pattern.permute.xlu1 %v4101_v13  ;;  %3482 = vset.pattern.permute.xlu2 %v4101_v13 }
 0x27e   : > { %3121 = vmatmul.msk.bf16.vlgmr.msrb.gmra.mxu2 %vm1484_vm8, %v1479_v5  ;;  %v1477_v11 = vpack.c.bf16 %v1173_v8, %v1173_v8  ;;  %3481 = vset.pattern.permute.xlu0 %v4101_v13  ;;  %vm983_vm9 = vcmp.ge.s32.totalorder %v4101_v13, %v4106_v14 }
 0x27f   : > { %3120 = vmatmul.msk.bf16.vlgmr.msrb.gmra.mxu1 %vm1484_vm8, %v1478_v6 }
 0x282   : > { %3118 = vmatmul.msk.bf16.vlgmr.msra.gmra.mxu3 %vm1484_vm8, %v1476_v9  ;;  %3119 = vmatmul.msk.bf16.vlgmr.msrb.gmra.mxu0 %vm1484_vm8, %v1477_v11 }
 0x2fc   : > { %v1538_v15 = vpop.f32.mrf.mxu1 }
 0x2fd   : > { %v1563_v16 = vmul.f32 0.35355338, %v1538_v15 }
 0x2ff   : > { %v1519_v17 = vpop.f32.mrf.mxu0  ;;  %v1569_v18 = vsel %vm983_vm9, %v1563_v16, -1e+30 }
 0x300   : > { %v1562_v19 = vmul.f32 0.35355338, %v1519_v17  ;;  %v1577_v20 = vsel %vm1484_vm8, %v1569_v18, -inf }
 0x301   : > { %1578 = vmax.xlane.f32.xlu0 %v1577_v20  ;;  %v1557_v21 = vpop.f32.mrf.mxu2 }
 0x302   : > { %v1564_v22 = vmul.f32 0.35355338, %v1557_v21  ;;  %v1568_v23 = vsel %vm983_vm9, %v1562_v19, -1e+30 }
 0x303   : > { %v1574_v24 = vsel %vm1484_vm8, %v1568_v23, -inf }
 0x304   : > { %v1540_v25 = vpop.f32.mrf.mxu1  ;;  %1575 = vmax.xlane.f32.xlu2 %v1574_v24  ;;  %v1570_v26 = vsel %vm983_vm9, %v1564_v22, -1e+30 }
 0x305   : > { %v1500_v27 = vpop.f32.mrf.mxu3  ;;  %v1580_v28 = vsel %vm1484_vm8, %v1570_v26, -inf }
 0x306   : > { %v1561_v29 = vmul.f32 0.35355338, %v1500_v27  ;;  %1581 = vmax.xlane.f32.xlu1 %v1580_v28 }
 0x307   : > { %v1521_v30 = vpop.f32.mrf.mxu0 }
 0x308   : > { %v1567_v31 = vsel %vm983_vm9, %v1561_v29, -1e+30 }
 0x309   : > { %v1559_v32 = vpop.f32.mrf.mxu2  ;;  %v1571_v33 = vsel %vm1484_vm8, %v1567_v31, -inf }
 0x30c   : > { %1572 = vmax.xlane.f32.xlu2 %v1571_v33 }
 0x30d   : > { %v1502_v34 = vpop.f32.mrf.mxu3 }
 0x315   : > { %1363 = vrot.lane.b32.xlu0 %v4004_v40, %s3679_s6 }
 0x31f   : > { %1360 = vrot.lane.b32.xlu1 %v4004_v40, %s3681_s28  ;;  %s4615_s28 = scalar_lea.vmem %s4521_s11, %s3885_s25 }
 0x324   : > { %1357 = vrot.lane.b32.xlu2 %v4004_v40, %s3680_s19 }
 0x374   : > { %v1579_v35 = vpop.xlane.xlu0 %1578 }
 0x375   : > { %v1585_v36 = vsub.f32 %v1569_v18, %v1579_v35 }
 0x377   : > { %v1591_v38 = vmul.f32 1.442695, %v1585_v36  ;;  %v1576_v39 = vpop.xlane.xlu2 %1575 }
 0x378   : > { %v1584_v47 = vsub.f32 %v1568_v23, %v1576_v39 }
 0x379   : > { %3494 = vpow2.f32 %v1591_v38  ;;  %v1582_v41 = vpop.xlane.xlu1 %1581 }
 0x37a   : > { %v1586_v42 = vsub.f32 %v1570_v26, %v1582_v41  ;;  %v1589_v52 = vmul.f32 1.442695, %v1584_v47 }
 0x37c   : > { %v1593_v43 = vmul.f32 1.442695, %v1586_v42 }
 0x37e   : > { %3496 = vpow2.f32 %v1593_v43 }
 0x37f   : > { %v4132_v44 = vpop.eup %3494  ;;  %v1573_v45 = vpop.xlane.xlu2 %1572 }
 0x380   : > { %v1583_v37 = vsub.f32 %v1567_v31, %v1573_v45  ;;  %v1601_v46 = vsel %vm1484_vm8, %v4132_v44, 0.0 }
 0x381   : > { %1602 = vadd.xlane.f32.xlu0 %v1601_v46 }
 0x382   : > { %v1587_v48 = vmul.f32 1.442695, %v1583_v37 }
 0x384   : > { %v4136_v49 = vpop.eup %3496  ;;  %3498 = vpow2.f32 %v1587_v48 }
 0x385   : > { %v1604_v50 = vsel %vm1484_vm8, %v4136_v49, 0.0  ;;  %3500 = vpow2.f32 %v1589_v52 }
 0x386   : > { %1605 = vadd.xlane.f32.xlu1 %v1604_v50 }
 0x387   : > { %v1364_v53 = vpop.permute.xlu0 %1363  ;;  %v1358_v54 = vpop.permute.xlu2 %1357 }
 0x388   : > { %v1380_v55 = vrot.slane %v1358_v54, 4  ;;  %v1378_v57 = vrot.slane %v1364_v53, 4 }
 0x38a   : > { %v4140_v56 = vpop.eup %3498  ;;  %v1381_v59 = vsel %vm1068_vm7, %v1364_v53, %v1380_v55  ;;  %v1379_v60 = vsel %vm1068_vm7, %v1378_v57, %v1358_v54 }
 0x38b   : > { %v1595_v58 = vsel %vm1484_vm8, %v4140_v56, 0.0  ;;  %v1389_v61 = vperm.slane %v1381_v59, %v4010_v51  ;;  %v4147_v63 = vpop.eup %3500  ;;  %v1385_v1 = vperm.slane %v1379_v60, %v4010_v51 }
 0x38c   : > { %1596 = vadd.xlane.f32.xlu2 %v1595_v58  ;;  %v1598_v8 = vsel %vm1484_vm8, %v4147_v63, 0.0 }
 0x38d   : > { %v1402_v6 = vrot.slane %v1389_v61, 4  ;;  %v1390_v11 = vrot.slane %v1385_v1, 4 }
 0x391   : > { %v1361_v3 = vpop.permute.xlu1 %1360 }
 0x392   : > { %v1366_v4 = vrot.slane %v1361_v3, 4  ;;  %v1369_v5 = vsel %vm1068_vm7, %v1361_v3, %v1368_v0 }
 0x393   : > { %v1377_v7 = vperm.slane %v1369_v5, %v4010_v51 }
 0x394   : > { %v1367_v9 = vsel %vm1068_vm7, %v1366_v4, %v4004_v40  ;;  %1599 = vadd.xlane.f32.xlu2 %v1598_v8 }
 0x395   : > { %v1373_v12 = vperm.slane %v1367_v9, %v4010_v51  ;;  %v1403_v15 = vsel %vm1068_vm7, %v1402_v6, %v1377_v7  ;;  %v1404_v16 = vrot.slane %v1377_v7, 4 }
 0x396   : > { %v1409_v17 = vperm.slane %v1403_v15, %v4015_v62 }
 0x397   : > { %v1391_v18 = vsel %vm1068_vm7, %v1390_v11, %v1373_v12  ;;  %v1392_v19 = vrot.slane %v1373_v12, 4  ;;  %v1405_v20 = vsel %vm1068_vm7, %v1389_v61, %v1404_v16 }
 0x398   : > { %v1397_v21 = vperm.slane %v1391_v18, %v4015_v62  ;;  %v1413_v22 = vperm.slane %v1405_v20, %v4015_v62  ;;  %v1418_v24 = vrot.slane %v1409_v17, 4 }
 0x399   : > { %v1393_v40 = vsel %vm1068_vm7, %v1385_v1, %v1392_v19 }
 0x39a   : > { %v1401_v23 = vperm.slane %v1393_v40, %v4015_v62  ;;  %v1420_v25 = vrot.slane %v1413_v22, 4  ;;  %v1414_v26 = vrot.slane %v1397_v21, 4  ;;  %v1419_v33 = vsel %vm1068_vm7, 0.0, %v1418_v24 }
 0x39c   : > { %v1416_v27 = vrot.slane %v1401_v23, 4  ;;  %v1421_v28 = vsel %vm1068_vm7, 0.0, %v1420_v25  ;;  %v1433_v29 = vsel %vm1068_vm7, %v1420_v25, %v1409_v17  ;;  %v1415_v41 = vsel %vm1068_vm7, 0.0, %v1414_v26 }
 0x39d   : > { %v1437_v30 = vperm.slane %v1433_v29, %v4010_v51  ;;  %v1438_v31 = vrot.slane %v1421_v28, 4 }
 0x39e   : > { %v1417_v32 = vsel %vm1068_vm7, 0.0, %v1416_v27  ;;  %v1422_v34 = vsel %vm1068_vm7, %v1416_v27, %v1397_v21 }
 0x39f   : > { %v1427_v35 = vrot.slane %v1417_v32, 4  ;;  %v1439_v36 = vsel %vm1068_vm7, %v1438_v31, %v1419_v33  ;;  %v1458_v38 = vrot.slane %v1437_v30, 4  ;;  %v1426_v39 = vperm.slane %v1422_v34, %v4010_v51 }
 0x3a0   : > { %v1443_v42 = vperm.slane %v1439_v36, %v4010_v51 }
 0x3a1   : > { %v1428_v43 = vsel %vm1068_vm7, %v1427_v35, %v1415_v41  ;;  %v1446_v45 = vrot.slane %v1426_v39, 4 }
 0x3a2   : > { %v1432_v37 = vperm.slane %v1428_v43, %v4010_v51  ;;  %v1459_v46 = vsel %vm1068_vm7, %v1443_v42, %v1458_v38  ;;  %v1456_v47 = vrot.slane %v1443_v42, 4 }
 0x3a3   : > { %v1467_v48 = vperm.slane %v1459_v46, %v4015_v62 }
 0x3a4   : > { %v1447_v50 = vsel %vm1068_vm7, %v1432_v37, %v1446_v45  ;;  %v1444_v52 = vrot.slane %v1432_v37, 4  ;;  %v1457_v53 = vsel %vm1068_vm7, %v1456_v47, %v1437_v30 }
 0x3a5   : > { %v1455_v54 = vperm.slane %v1447_v50, %v4015_v62  ;;  %v1472_v55 = vrot.slane %v1467_v48, 4  ;;  %v1463_v57 = vperm.slane %v1457_v53, %v4015_v62 }
 0x3a6   : > { %v1445_v58 = vsel %vm1068_vm7, %v1444_v52, %v1426_v39 }
 0x3a7   : > { %v1473_v59 = vsel %vm1068_vm7, %v1472_v55, %v1455_v54  ;;  %v1451_v60 = vperm.slane %v1445_v58, %v4015_v62  ;;  %v1468_v61 = vrot.slane %v1463_v57, 4  ;;  %v1474_v0 = vrot.slane %v1455_v54, 4 }
 0x3a8   : > { %v1621_v1 = vpack.c.bf16 %v1473_v59, %v1473_v59 }
 0x3a9   : > { %v1469_v3 = vsel %vm1068_vm7, %v1468_v61, %v1451_v60  ;;  %v1470_v4 = vrot.slane %v1451_v60, 4  ;;  %v1475_v5 = vsel %vm1068_vm7, %v1467_v48, %v1474_v0 }
 0x3aa   : > { %v1666_v6 = vsel %vm1626_vm10, %v1621_v1, 0  ;;  %v1619_v7 = vpack.c.bf16 %v1469_v3, %v1469_v3  ;;  %v1622_v8 = vpack.c.bf16 %v1475_v5, %v1475_v5 }
 0x3ab   : > { %1675 = vmatpush.bf16.msra.mxu1 %v1666_v6  ;;  %v1471_v9 = vsel %vm1068_vm7, %v1463_v57, %v1470_v4 }
 0x3ac   : > { %v1628_v11 = vsel %vm1626_vm10, %v1619_v7, 0  ;;  %v1685_v12 = vsel %vm1626_vm10, %v1622_v8, 0  ;;  %v1620_v15 = vpack.c.bf16 %v1471_v9, %v1471_v9 }
 0x3ad   : > { %1637 = vmatpush.bf16.msrb.mxu3 %v1628_v11  ;;  %1694 = vmatpush.bf16.msra.mxu2 %v1685_v12 }
 0x3ae   : > { %v1647_v16 = vsel %vm1626_vm10, %v1620_v15, 0 }
 0x3af   : > { %1656 = vmatpush.bf16.msra.mxu0 %v1647_v16 }
 0x3f4   : > { %v1603_v17 = vpop.xlane.xlu0 %1602 }
 0x3f5   : > { %3502 = vrcp.f32 %v1603_v17 }
 0x3f9   : > { %v1606_v18 = vpop.xlane.xlu1 %1605 }
 0x3fa   : > { %3504 = vrcp.f32 %v1606_v18 }
 0x3fb   : > { %v3503_v19 = vpop.eup %3502 }
 0x3fc   : > { %v1613_v20 = vmul.f32 %v3503_v19, %v4132_v44 }
 0x3fe   : > { %v1617_v21 = vpack.c.bf16 %v1613_v20, %v1613_v20 }
 0x3ff   : > { %v1597_v22 = vpop.xlane.xlu2 %1596 }
 0x400   : > { %v3505_v40 = vpop.eup %3504  ;;  %3124 = vmatmul.msk.bf16.vlgmr.msra.gmra.mxu1 %vm1484_vm8, %v1617_v21  ;;  %3506 = vrcp.f32 %v1597_v22 }
 0x401   : > { %v1614_v23 = vmul.f32 %v3505_v40, %v4136_v49 }
 0x403   : > { %v1618_v24 = vpack.c.bf16 %v1614_v23, %v1614_v23 }
 0x405   : > { %3125 = vmatmul.msk.bf16.vlgmr.msra.gmra.mxu2 %vm1484_vm8, %v1618_v24 }
 0x406   : > { %v3507_v25 = vpop.eup %3506 }
 0x407   : > { %v1611_v26 = vmul.f32 %v3507_v25, %v4140_v56  ;;  %v1600_v27 = vpop.xlane.xlu2 %1599 }
 0x408   : > { %3508 = vrcp.f32 %v1600_v27 }
 0x409   : > { %v1615_v28 = vpack.c.bf16 %v1611_v26, %v1611_v26 }
 0x40b   : > { %3122 = vmatmul.msk.bf16.vlgmr.msrb.gmra.mxu3 %vm1484_vm8, %v1615_v28 }
 0x40e   : > { %v3509_v44 = vpop.eup %3508 }
 0x40f   : > { %v1612_v29 = vmul.f32 %v3509_v44, %v4147_v63 }
 0x411   : > { %v1616_v30 = vpack.c.bf16 %v1612_v29, %v1612_v29 }
 0x413   : > { %3123 = vmatmul.msk.bf16.vlgmr.msra.gmra.mxu0 %vm1484_vm8, %v1616_v30 }
 0x47d   : > { %v1677_v31 = vpop.f32.mrf.mxu1 }
 0x47e   : > { %v1700_v33 = vrot.slane %v1677_v31, 4 }
 0x485   : > { %v1679_v32 = vpop.f32.mrf.mxu1 }
 0x488   : > { %v1696_v49 = vpop.f32.mrf.mxu2 }
 0x489   : > { %v1712_v35 = vrot.slane %v1696_v49, 4 }
 0x48e   : > { %v1639_v34 = vpop.f32.mrf.mxu3 }
 0x48f   : > { %v1701_v36 = vsel %vm1068_vm7, %v1700_v33, %v1639_v34  ;;  %v1702_v56 = vrot.slane %v1639_v34, 4 }
 0x490   : > { %v1707_v38 = vperm.slane %v1701_v36, %v4010_v51  ;;  %v1658_v39 = vpop.f32.mrf.mxu0  ;;  %v1698_v41 = vpop.f32.mrf.mxu2 }
 0x491   : > { %v1703_v42 = vsel %vm1068_vm7, %v1677_v31, %v1702_v56  ;;  %v1713_v63 = vsel %vm1068_vm7, %v1712_v35, %v1658_v39  ;;  %v1714_v43 = vrot.slane %v1658_v39, 4 }
 0x492   : > { %v1711_v45 = vperm.slane %v1703_v42, %v4010_v51  ;;  %v1726_v37 = vrot.slane %v1707_v38, 4  ;;  %v1719_v46 = vperm.slane %v1713_v63, %v4010_v51  ;;  %v3344_v63 = vld [vmem:[%s4609_s21 + $0x8] sm:$0xff] }
 0x493   : > { %v1715_v47 = vsel %vm1068_vm7, %v1696_v49, %v1714_v43  ;;  %1857 = vmatpush.bf16.msra.mxu3 %v3344_v63  ;;  %v3343_v43 = vld [vmem:[%s4609_s21] sm:$0xff] }
 0x494   : > { %v1738_v48 = vrot.slane %v1711_v45, 4  ;;  %v1723_v50 = vperm.slane %v1715_v47, %v4010_v51  ;;  %v1724_v52 = vrot.slane %v1719_v46, 4  ;;  %v1727_v53 = vsel %vm1068_vm7, %v1719_v46, %v1726_v37 }
 0x495   : > { %v1735_v54 = vperm.slane %v1727_v53, %v4015_v62  ;;  %v3486_v53 = vld [vmem:[%s4611_s20] ss:$0 sm:$0xff] }
 0x496   : > { %v1725_v55 = vsel %vm1068_vm7, %v1724_v52, %v1707_v38  ;;  %v1736_v57 = vrot.slane %v1723_v50, 4  ;;  %v1739_v58 = vsel %vm1068_vm7, %v1723_v50, %v1738_v48  ;;  %v1641_v59 = vpop.f32.mrf.mxu3 }
 0x497   : > { %v1731_v60 = vperm.slane %v1725_v55, %v4015_v62  ;;  %v1747_v61 = vperm.slane %v1739_v58, %v4015_v62  ;;  %v1750_v0 = vrot.slane %v1735_v54, 4  ;;  %1858 = vmatpush.bf16.msra.mxu3 %v3343_v43 }
 0x498   : > { %v1737_v1 = vsel %vm1068_vm7, %v1736_v57, %v1711_v45  ;;  %v1660_v3 = vpop.f32.mrf.mxu0 }
 0x499   : > { %v1743_v4 = vperm.slane %v1737_v1, %v4015_v62  ;;  %v1748_v5 = vrot.slane %v1731_v60, 4  ;;  %v1751_v6 = vsel %vm1068_vm7, 0.0, %v1750_v0  ;;  %v1754_v7 = vrot.slane %v1747_v61, 4 }
 0x49a   : > { %v1756_v8 = vsel %vm1068_vm7, %v1750_v0, %v1731_v60  ;;  %v1761_v9 = vrot.slane %v1751_v6, 4  ;;  %v3346_v6 = vld [vmem:[%s3934_s22 + $0x8] sm:$0xff] }
 0x49b   : > { %v1749_v11 = vsel %vm1068_vm7, 0.0, %v1748_v5  ;;  %v1752_v12 = vrot.slane %v1743_v4, 4  ;;  %v1755_v15 = vsel %vm1068_vm7, 0.0, %v1754_v7  ;;  %v1760_v16 = vperm.slane %v1756_v8, %v4010_v51  ;;  %v3351_v5 = vld [vmem:[%s3944_s16 + $0x24] sm:$0xf]  ;;  %1927 = vmatpush.bf16.msrb.mxu0 %v3346_v6 }
 0x49c   : > { %v1772_v17 = vrot.slane %v1755_v15, 4  ;;  %v1762_v18 = vsel %vm1068_vm7, %v1761_v9, %v1749_v11  ;;  %v1767_v19 = vsel %vm1068_vm7, %v1754_v7, %v1743_v4  ;;  %v3353_v4 = vld [vmem:[%s3944_s16 + $0x2c] sm:$0xf0]  ;;  %v3166_v8 = vld [vmem:[%s3944_s16 + $0x30] sm:$0xf0]  ;;  %v3345_v15 = vld [vmem:[%s3934_s22] sm:$0xff] }
 0x49d   : > { %v1753_v20 = vsel %vm1068_vm7, 0.0, %v1752_v12  ;;  %v1766_v21 = vperm.slane %v1762_v18, %v4010_v51  ;;  %v1771_v22 = vperm.slane %v1767_v19, %v4010_v51  ;;  %v1780_v40 = vrot.slane %v1760_v16, 4  ;;  %v3172_v9 = vld [vmem:[%s3944_s16 + $0x28] sm:$0xf]  ;;  %v3354_v12 = vld [vmem:[%s3944_s16 + $0x34] sm:$0xf0] }
 0x49e   : > { %v1773_v23 = vsel %vm1068_vm7, %v1772_v17, %v1753_v20  ;;  %v3169_v11 = vor.u32 %v3351_v5, %v3166_v8  ;;  %v3173_v17 = vor.u32 %v3354_v12, %v3172_v9  ;;  %v3349_v18 = vld [vmem:[%s3944_s16 + $0xc] sm:$0xf0]  ;;  %v3347_v19 = vld [vmem:[%s3944_s16 + $0x4] sm:$0xf]  ;;  %v3150_v20 = vld [vmem:[%s3944_s16 + $0x10] sm:$0xf0] }
 0x49f   : > { %v1777_v24 = vperm.slane %v1773_v23, %v4010_v51  ;;  %v1781_v25 = vsel %vm1068_vm7, %v1766_v21, %v1780_v40  ;;  %v1792_v26 = vrot.slane %v1771_v22, 4  ;;  %v1778_v27 = vrot.slane %v1766_v21, 4  ;;  %v3156_v40 = vld [vmem:[%s3944_s16 + $0x8] sm:$0xf]  ;;  %v3350_v23 = vld [vmem:[%s3944_s16 + $0x14] sm:$0xf0]  ;;  %1928 = vmatpush.bf16.msrb.mxu0 %v3345_v15 }
 0x4a0   : > { %v1789_v28 = vperm.slane %v1781_v25, %v4015_v62  ;;  %2087 = vmatpush.bf16.msrb.mxu2 %v3169_v11  ;;  %2100 = vmatpush.bf16.msrb.mxu3 %v3173_v17 }
 0x4a1   : > { %v1793_v44 = vsel %vm1068_vm7, %v1777_v24, %v1792_v26  ;;  %v1779_v29 = vsel %vm1068_vm7, %v1778_v27, %v1760_v16  ;;  %v1790_v30 = vrot.slane %v1777_v24, 4  ;;  %v3148_v16 = vld [vmem:[%s3944_s16] sm:$0xf]  ;;  %v3157_v24 = vor.u32 %v3350_v23, %v3156_v40  ;;  %v3352_v26 = vld [vmem:[%s3944_s16 + $0x2c] sm:$0xf] }
 0x4a2   : > { %v1801_v31 = vperm.slane %v1793_v44, %v4015_v62  ;;  %v1808_v32 = vrot.slane %v1789_v28, 4  ;;  %v1785_v49 = vperm.slane %v1779_v29, %v4015_v62  ;;  %v3149_v21 = vor.u32 %v3349_v18, %v3148_v16  ;;  %v3174_v27 = vld [vmem:[%s3944_s16 + $0x38] sm:$0xf0] }
 0x4a3   : > { %v1791_v33 = vsel %vm1068_vm7, %v1790_v30, %v1771_v22  ;;  %v3153_v22 = vor.u32 %v3347_v19, %v3150_v20  ;;  %v3177_v29 = vor.u32 %v3352_v26, %v3174_v27  ;;  %v3158_v30 = vld [vmem:[%s3944_s16 + $0x18] sm:$0xf0] }
 0x4a4   : > { %v1809_v34 = vsel %vm1068_vm7, %v1801_v31, %v1808_v32  ;;  %v1806_v35 = vrot.slane %v1801_v31, 4  ;;  %v1797_v36 = vperm.slane %v1791_v33, %v4015_v62  ;;  %v1804_v56 = vrot.slane %v1785_v49, 4  ;;  %2101 = vmatpush.bf16.msrb.mxu3 %v3157_v24 }
 0x4a5   : > { %1819 = vrot.lane.b32.xlu0 %v1809_v34, %s3684_s15  ;;  %2088 = vmatpush.bf16.msrb.mxu2 %v3153_v22 }
 0x4a6   : > { %v1807_v38 = vsel %vm1068_vm7, %v1806_v35, %v1789_v28  ;;  %v1802_v39 = vrot.slane %v1797_v36, 4  ;;  %v1805_v41 = vsel %vm1068_vm7, %v1797_v36, %v1804_v56  ;;  %v3348_v28 = vld [vmem:[%s3944_s16 + $0xc] sm:$0xf]  ;;  %2113 = vmatpush.bf16.msra.mxu0 %v3177_v29 }
 0x4a7   : > { %1815 = vrot.lane.b32.xlu2 %v1807_v38, %s3685_s3  ;;  %1811 = vrot.lane.b32.xlu1 %v1805_v41, %s3686_s29  ;;  %v3161_v32 = vor.u32 %v3348_v28, %v3158_v30 }
 0x4a8   : > { %v1803_v42 = vsel %vm1068_vm7, %v1802_v39, %v1785_v49 }
 0x4aa   : > { %2114 = vmatpush.bf16.msra.mxu0 %v3161_v32 }
 0x501   : > { %v1816_v37 = vpop.permute.xlu2 %1815 }
 0x517   : > { %v1820_v47 = vpop.permute.xlu0 %1819 }
 0x519   : > { %v1812_v45 = vpop.permute.xlu1 %1811 }
 0x51a   : > { %v1822_v46 = vsel %vm1484_vm8, %v1803_v42, %v1812_v45  ;;  %v3488_v42 = vld [vmem:[%s4614_s23] ss:$0 sm:$0xff]  ;;  %vm2004_vm8 = vcmask 25600  }
 0x51b   : > { %v1824_v48 = vsel %vm1823_vm11, %v1822_v46, %v1816_v37  ;;  %v2018_v37 = vld [vmem:[%s3950_s2] sm:$0xf] }
 0x51c   : > { %v1826_v50 = vsel %vm1825_vm12, %v1824_v48, %v1820_v47  ;;  %v3489_v46 = vld [vmem:[%s4615_s28] ss:$0 sm:$0xff]  ;;  %v2020_v47 = vperm.slane %v2018_v37, 0  ;;  %v2023_v8 = vperm.slane %v2018_v37, 3 }
 0x51d   : > { %v1827_v52 = vpack.c.bf16 %v1826_v50, %v1826_v50 }
 0x51f   : > { %3134 = vmatmul.msk.bf16.vlgmr.msra.gmra.mxu3 %vm986_vm2, %v1827_v52 }
 0x5a2   : > { %v1860_v54 = vpop.f32.mrf.mxu3 }
 0x5a3   : > { %v1861_v55 = vadd.f32 %v3486_v53, %v1860_v54 }
 0x5a5   : > { %v4252_v57 = vadd.f32 %v1861_v55, %v3972_v2  ;;  %v3164_v2 = vld [vmem:[%s3944_s16 + $0x20] sm:$0xf]  ;;  %s4613_s16 = scalar_lea.vmem %s4612_s8, %s3885_s25  ;;  %v2022_v55 = vperm.slane %v2018_v37, 2  ;;  %s4616_s25 = sld [smem:[#allocation13_spill]] }
 0x5a6   : > { %v3165_v7 = vor.u32 %v3353_v4, %v3164_v2  ;;  %v3487_v38 = vld [vmem:[%s4613_s16] ss:$0 sm:$0xff] }
 0x5a7   : > { %v1867_v58 = vsel %vm986_vm2, %v4252_v57, 0.0 }
 0x5a8   : > { %1868 = vadd.xlane.f32.xlu1 %v1867_v58  ;;  %2074 = vmatpush.bf16.msrb.mxu1 %v3165_v7 }
 0x5aa   : > { %v1862_v59 = vpop.f32.mrf.mxu3 }
 0x5ab   : > { %v2021_v59 = vperm.slane %v2018_v37, 1  ;;  %p3312_p1 = scmp.ne.s32.totalorder %s4616_s25, 1 }
 0x5ac   : > { %2075 = vmatpush.bf16.msrb.mxu1 %v3149_v21  ;;  %s4618_s30 = sld [smem:[#allocation36_spill]] (!%p3312_p1) }
 0x5ad   : > { %s4619_s22 = sld [smem:[#allocation37_spill]] (!%p3312_p1) }
 0x5ae   : > { %s4620_s17 = sld [smem:[#allocation39_spill]] (!%p3312_p1) }
 0x61b   : > { %v1869_v60 = vpop.xlane.xlu1 %1868 }
 0x61c   : > { %v1870_v61 = vmul.f32 %v1869_v60, %v3976_v10 }
 0x61e   : > { %v1871_v0 = vsub.f32 %v4252_v57, %v1870_v61 }
 0x620   : > { %v1872_v1 = vmul.f32 %v1871_v0, %v1871_v0 }
 0x622   : > { %v1873_v3 = vsel %vm986_vm2, %v1872_v1, 0.0 }
 0x623   : > { %1874 = vadd.xlane.f32.xlu0 %v1873_v3 }
 0x696   : > { %v1875_v25 = vpop.xlane.xlu0 %1874 }
 0x697   : > { %v1876_v44 = vmul.f32 %v1875_v25, %v3976_v10 }
 0x699   : > { %v1877_v31 = vadd.f32 1e-05, %v1876_v44 }
 0x69b   : > { %3510 = vrsqrt.f32 %v1877_v31  ;;  %vm1884_vm14 = vweird.f32 %v1877_v31 }
 0x6a1   : > { %v3511_v49 = vpop.eup %3510 }
 0x6a2   : > { %v1879_v33 = vmul.f32 %v3511_v49, %v1877_v31  ;;  %vm1885_vm13 = vweird.f32 %v3511_v49 }
 0x6a3   : > { %vm1886_vm15 = vmor %vm1884_vm14, %vm1885_vm13 }
 0x6a4   : > { %v1880_v34 = vmul.f32 %v3511_v49, %v1879_v33 }
 0x6a6   : > { %v1881_v35 = vmul.f32 0.5, %v1880_v34 }
 0x6a8   : > { %v1882_v36 = vsub.f32 1.5, %v1881_v35 }
 0x6aa   : > { %v1883_v56 = vmul.f32 %v3511_v49, %v1882_v36 }
 0x6ac   : > { %v1887_v39 = vsel %vm1886_vm15, %v3511_v49, %v1883_v56 }
 0x6ad   : > { %v1888_v41 = vmul.f32 %v1887_v39, %v1871_v0 }
 0x6af   : > { %v1892_v63 = vmul.f32 %v3487_v38, %v1888_v41 }
 0x6b1   : > { %v1896_v43 = vadd.f32 %v3488_v42, %v1892_v63 }
 0x6b3   : > { %v1897_v45 = vpack.c.bf16 %v1896_v43, %v1896_v43 }
 0x6b5   : > { %3143 = vmatmul.msk.bf16.vlgmr.msrb.gmra.mxu0 %vm986_vm2, %v1897_v45  ;;  %3178 = vmatmul.msk.bf16.vlgmr.msrb.gmra.mxu1 %vm986_vm2, %v1897_v45 }
 0x6b6   : > { %3179 = vmatmul.msk.bf16.vlgmr.msrb.gmra.mxu2 %vm986_vm2, %v1897_v45  ;;  %3180 = vmatmul.msk.bf16.vlgmr.msrb.gmra.mxu3 %vm986_vm2, %v1897_v45 }
 0x6c5   : > { %3181 = vmatmul.msk.bf16.vlgmr.msra.gmra.mxu0 %vm986_vm2, %v1897_v45 }
 0x732   : > { %v1930_v48 = vpop.f32.mrf.mxu0  ;;  %v2077_v50 = vpop.f32.mrf.mxu1 }
 0x733   : > { %v1931_v52 = vadd.f32 %v3489_v46, %v1930_v48  ;;  %v2078_v53 = vadd.f32 %v2077_v50, %v2020_v47 }
 0x735   : > { %v1935_v54 = vsel %vm1934_vm0, %v1931_v52, -inf  ;;  %v2120_v58 = vmax.f32 %v2078_v53, 0.0 }
 0x736   : > { %1936 = vmax.xlane.f32.xlu2 %v1935_v54 }
 0x737   : > { %v2126_v2 = vrot.slane %v2120_v58, 4 }
 0x739   : > { %v2090_v60 = vpop.f32.mrf.mxu2  ;;  %v2103_v61 = vpop.f32.mrf.mxu3 }
 0x73a   : > { %v2104_v0 = vadd.f32 %v2103_v61, %v2022_v55  ;;  %v1932_v1 = vpop.f32.mrf.mxu0  ;;  %v2079_v3 = vpop.f32.mrf.mxu1  ;;  %v2091_v5 = vadd.f32 %v2090_v60, %v2021_v59 }
 0x73c   : > { %v2122_v4 = vmax.f32 %v2104_v0, 0.0  ;;  %v2121_v11 = vmax.f32 %v2091_v5, 0.0  ;;  %v3687_v0 = vmov 0.0  }
 0x73e   : > { %v2124_v6 = vrot.slane %v2122_v4, 4  ;;  %v2127_v7 = vsel %vm1068_vm7, %v2122_v4, %v2126_v2  ;;  %v2138_v19 = vrot.slane %v2121_v11, 4  ;;  %v2001_v2 = vld [vmem:[%s3965_s4] sm:$0x3] }
 0x73f   : > { %v2135_v18 = vperm.slane %v2127_v7, %v4010_v51 }
 0x740   : > { %v2125_v9 = vsel %vm1068_vm7, %v2124_v6, %v2120_v58  ;;  %v1997_v58 = vstv %s4616_s25 }
 0x741   : > { %v2092_v12 = vpop.f32.mrf.mxu2  ;;  %v2105_v15 = vpop.f32.mrf.mxu3  ;;  %v2131_v21 = vperm.slane %v2125_v9, %v4010_v51  ;;  %v2162_v24 = vrot.slane %v2135_v18, 4  ;;  %vm1998_vm6 = vcmp.eq.s32.totalorder %v4101_v13, %v1997_v58  ;;  %v3367_v58 = vld [vmem:[%s3956_s5 + $0x60] sm:$0xff] }
 0x742   : > { %v2116_v16 = vpop.f32.mrf.mxu0  ;;  %v3145_v1 = vsel %vm1998_vm6, 1.0, %v3687_v0 }
 0x743   : > { %v2117_v17 = vadd.f32 %v2116_v16, %v2023_v8  ;;  %v2150_v26 = vrot.slane %v2131_v21, 4 }
 0x745   : > { %v2123_v20 = vmax.f32 %v2117_v17, 0.0  ;;  %v2368_v17 = vld [vmem:[%s3961_s27] sm:$0xf] }
 0x746   : > { %3182 = vmatpush.msk.msra.mxu1 %vm1626_vm10, %v2368_v17  ;;  %v3363_v17 = vld [vmem:[%s3956_s5 + $0x40] sm:$0xff] }
 0x747   : > { %v2136_v22 = vrot.slane %v2123_v20, 4  ;;  %v2139_v40 = vsel %vm1068_vm7, %v2123_v20, %v2138_v19 }
 0x748   : > { %v2147_v23 = vperm.slane %v2139_v40, %v4010_v51 }
 0x749   : > { %v2137_v25 = vsel %vm1068_vm7, %v2136_v22, %v2121_v11 }
 0x74a   : > { %v2143_v27 = vperm.slane %v2137_v25, %v4010_v51  ;;  %v2160_v28 = vrot.slane %v2147_v23, 4  ;;  %v2118_v44 = vpop.f32.mrf.mxu0  ;;  %v4309_v29 = vsel %vm1068_vm7, %v2147_v23, %v2162_v24 }
 0x74c   : > { %v2148_v30 = vrot.slane %v2143_v27, 4  ;;  %v4312_v31 = vsel %vm1068_vm7, %v2143_v27, %v2150_v26  ;;  %v4315_v32 = vsel %vm1068_vm7, %v2160_v28, %v2135_v18 }
 0x74e   : > { %v4318_v49 = vsel %vm1068_vm7, %v2148_v30, %v2131_v21 }
 0x7a9   : > { %v1937_v33 = vpop.xlane.xlu2 %1936 }
 0x7aa   : > { %v1938_v34 = vsub.f32 %v1931_v52, %v1937_v33 }
 0x7ac   : > { %v1939_v35 = vmul.f32 1.442695, %v1938_v34 }
 0x7ae   : > { %3512 = vpow2.f32 %v1939_v35 }
 0x7b4   : > { %v3513_v36 = vpop.eup %3512 }
 0x7b5   : > { %v1941_v56 = vsel %vm1934_vm0, %v3513_v36, 0.0 }
 0x7b6   : > { %1942 = vadd.xlane.f32.xlu1 %v1941_v56 }
 0x829   : > { %v1943_v38 = vpop.xlane.xlu1 %1942 }
 0x82a   : > { %3514 = vrcp.f32 %v1943_v38  ;;  %v1955_v63 = vand.u32 2147483648, %v1943_v38  ;;  %v1953_v45 = vand.u32 2147483647, %v1943_v38  ;;  %vm1949_vm3 = vweird.f32 %v1943_v38 }
 0x82c   : > { %v1956_v46 = vor.u32 1.1754944e-38, %v1955_v63  ;;  %vm1954_vm5 = vcmp.eq.f32.partialorder %v1953_v45, 8.507059e+37  ;;  %v3362_v45 = vld [vmem:[%s3956_s5 + $0x38] sm:$0xff] }
 0x82d   : > { %2587 = vmatpush.bf16.msra.mxu2 %v3362_v45 }
 0x830   : > { %v3515_v39 = vpop.eup %3514 }
 0x831   : > { %v1945_v41 = vmul.f32 %v3515_v39, %v1943_v38  ;;  %vm1950_vm1 = vweird.f32 %v3515_v39  ;;  %v2006_v38 = vld [vmem:[%s3967_s24] sm:$0x3] }
 0x832   : > { %vm1951_vm4 = vmor %vm1949_vm3, %vm1950_vm1 }
 0x833   : > { %v1946_v42 = vsub.f32 1.0, %v1945_v41 }
 0x835   : > { %v1947_v43 = vmul.f32 %v3515_v39, %v1946_v42 }
 0x837   : > { %v1948_v37 = vadd.f32 %v3515_v39, %v1947_v43  ;;  %v3370_v43 = vld [vmem:[%s3956_s5 + $0x78] sm:$0xff] }
 0x838   : > { %2600 = vmatpush.bf16.msra.mxu3 %v3370_v43 }
 0x839   : > { %v1952_v47 = vsel %vm1951_vm4, %v3515_v39, %v1948_v37  ;;  %v3386_v37 = vld [vmem:[%s3956_s5 + $0xf8] sm:$0xff] }
 0x83a   : > { %v1957_v48 = vsel %vm1954_vm5, %v1956_v46, %v1952_v47  ;;  %2626 = vmatpush.bf16.msrb.mxu1 %v3386_v37  ;;  %v3369_v46 = vld [vmem:[%s3956_s5 + $0x70] sm:$0xff]  ;;  %v3378_v47 = vld [vmem:[%s3956_s5 + $0xb8] sm:$0xff] }
 0x83b   : > { %v1958_v50 = vmul.f32 %v3513_v36, %v1957_v48  ;;  %2613 = vmatpush.bf16.msrb.mxu0 %v3378_v47  ;;  %v3361_v48 = vld [vmem:[%s3956_s5 + $0x30] sm:$0xff] }
 0x83c   : > { %2601 = vmatpush.bf16.msra.mxu3 %v3369_v46  ;;  %2588 = vmatpush.bf16.msra.mxu2 %v3361_v48 }
 0x83d   : > { %v1959_v52 = vsel %vm1934_vm0, %v1958_v50, -inf  ;;  %v1981_v53 = vsel %vm1934_vm0, %v1958_v50, 0.0 }
 0x83e   : > { %v1982_v54 = vrot.slane %v1981_v53, 4  ;;  %1960 = vmax.xlane.f32.xlu0 %v1959_v52  ;;  %v3368_v52 = vld [vmem:[%s3956_s5 + $0x68] sm:$0xff] }
 0x840   : > { %v1983_v55 = vadd.f32 %v1982_v54, %v1981_v53  ;;  %v3377_v53 = vld [vmem:[%s3956_s5 + $0xb0] sm:$0xff]  ;;  %2602 = vmatpush.bf16.msra.mxu3 %v3368_v52  ;;  %v3360_v54 = vld [vmem:[%s3956_s5 + $0x28] sm:$0xff] }
 0x841   : > { %2614 = vmatpush.bf16.msrb.mxu0 %v3377_v53  ;;  %2589 = vmatpush.bf16.msra.mxu2 %v3360_v54 }
 0x842   : > { %v1984_v59 = vrot.slane %v1983_v55, 2 }
 0x844   : > { %v1985_v60 = vadd.f32 %v1984_v59, %v1983_v55  ;;  %v3384_v55 = vld [vmem:[%s3956_s5 + $0xe8] sm:$0xff]  ;;  %2603 = vmatpush.bf16.msra.mxu3 %v3367_v58 }
 0x845   : > { %v3376_v59 = vld [vmem:[%s3956_s5 + $0xa8] sm:$0xff] }
 0x846   : > { %v1986_v61 = vrot.slane %v1985_v60, 1  ;;  %2615 = vmatpush.bf16.msrb.mxu0 %v3376_v59 }
 0x848   : > { %v1987_v3 = vadd.f32 %v1986_v61, %v1985_v60  ;;  %v3359_v60 = vld [vmem:[%s3956_s5 + $0x20] sm:$0xff] }
 0x849   : > { %v3383_v61 = vld [vmem:[%s3956_s5 + $0xe0] sm:$0xff]  ;;  %2590 = vmatpush.bf16.msra.mxu2 %v3359_v60 }
 0x84a   : > { %v2002_v4 = vmul.f32 %v3145_v1, %v1987_v3 }
 0x84c   : > { %v2003_v5 = vadd.f32 %v2002_v4, %v2001_v2  ;;  %v3358_v2 = vld [vmem:[%s3956_s5 + $0x18] sm:$0xff] }
 0x84d   : > { %v3382_v4 = vld [vmem:[%s3956_s5 + $0xd8] sm:$0xff]  ;;  %2591 = vmatpush.bf16.msra.mxu2 %v3358_v2 }
 0x84e   : > { %2005 = vst.msk [vmem:[%s3965_s4] sm:$0x3] %vm2004_vm8, %v2003_v5  ;;  %v3365_v5 = vld [vmem:[%s3956_s5 + $0x50] sm:$0xff] }
 0x8b1   : > { %v1961_v6 = vpop.xlane.xlu0 %1960 }
 0x8b2   : > { %vm1962_vm9 = vcmp.eq.f32.partialorder %v1958_v50, %v1961_v6  ;;  %v3385_v50 = vld [vmem:[%s3956_s5 + $0xf0] sm:$0xff] }
 0x8b3   : > { %v1963_v7 = vsel %vm1962_vm9, %v4106_v14, 4  ;;  %2627 = vmatpush.bf16.msrb.mxu1 %v3385_v50 }
 0x8b4   : > { %v1964_v8 = vsel %vm1934_vm0, %v1963_v7, 2147483647  ;;  %v3357_v7 = vld [vmem:[%s3956_s5 + $0x10] sm:$0xff] }
 0x8b5   : > { %v1966_v9 = vshra.s32 %v1964_v8, 16  ;;  %v1965_v13 = vand.u32 65535, %v1964_v8  ;;  %v3381_v8 = vld [vmem:[%s3956_s5 + $0xd0] sm:$0xff]  ;;  %2592 = vmatpush.bf16.msra.mxu2 %v3357_v7 }
 0x8b7   : > { %v1968_v11 = vcvt.s32.f32 %v1966_v9  ;;  %v1967_v15 = vcvt.s32.f32 %v1965_v13  ;;  %2628 = vmatpush.bf16.msrb.mxu1 %v3384_v55  ;;  %v3364_v9 = vld [vmem:[%s3956_s5 + $0x48] sm:$0xff] }
 0x8b8   : > { %v3356_v13 = vld [vmem:[%s3956_s5 + $0x8] sm:$0xff] }
 0x8b9   : > { %1969 = vmin.xlane.f32.xlu2 %v1968_v11  ;;  %2593 = vmatpush.bf16.msra.mxu2 %v3356_v13 }
 0x8bb   : > { %2629 = vmatpush.bf16.msrb.mxu1 %v3383_v61 }
 0x8bf   : > { %2630 = vmatpush.bf16.msrb.mxu1 %v3382_v4 }
 0x8c3   : > { %2631 = vmatpush.bf16.msrb.mxu1 %v3381_v8 }
 0x92c   : > { %v1970_v12 = vpop.xlane.xlu2 %1969 }
 0x92d   : > { %vm1971_vm11 = vcmp.eq.f32.partialorder %v1968_v11, %v1970_v12  ;;  %v1976_v18 = vcvt.f32.s32 %v1970_v12  ;;  %v3373_v11 = vld [vmem:[%s3956_s5 + $0x90] sm:$0xff]  ;;  %v3380_v12 = vld [vmem:[%s3956_s5 + $0xc8] sm:$0xff] }
 0x92e   : > { %v1972_v16 = vsel %vm1971_vm11, %v1967_v15, inf  ;;  %v2171_v15 = vperm.slane %v4309_v29, %v4015_v62  ;;  %2632 = vmatpush.bf16.msrb.mxu1 %v3380_v12 }
 0x92f   : > { %1973 = vmin.xlane.f32.xlu1 %v1972_v16  ;;  %v1977_v20 = vshll.u32 %v1976_v18, 16  ;;  %v3372_v18 = vld [vmem:[%s3956_s5 + $0x88] sm:$0xff] }
 0x9a2   : > { %v1974_v19 = vpop.xlane.xlu1 %1973 }
 0x9a3   : > { %v1975_v21 = vcvt.f32.s32 %v1974_v19  ;;  %v3355_v19 = vld [vmem:[%s3956_s5] sm:$0xff] }
 0x9a4   : > { %2594 = vmatpush.bf16.msra.mxu2 %v3355_v19 }
 0x9a5   : > { %v1978_v22 = vadd.s32 %v1977_v20, %v1975_v21  ;;  %v3379_v20 = vld [vmem:[%s3956_s5 + $0xc0] sm:$0xff]  ;;  %v2167_v21 = vperm.slane %v4315_v32, %v4015_v62 }
 0x9a6   : > { %2633 = vmatpush.bf16.msrb.mxu1 %v3379_v20 }
 0x9a7   : > { %vm1979_vm12 = vcmp.eq.s32.totalorder %v4106_v14, %v1978_v22  ;;  %v2159_v22 = vperm.slane %v4312_v31, %v4015_v62  ;;  %v2176_v29 = vrot.slane %v2167_v21, 4 }
 0x9a8   : > { %v1980_v40 = vsel %vm1979_vm12, %v1961_v6, 0.0  ;;  %v3144_v23 = vsel %vm1979_vm12, 1.0, %v3687_v0  ;;  %v3366_v0 = vld [vmem:[%s3956_s5 + $0x58] sm:$0xff] }
 0x9a9   : > { %v1990_v24 = vsel %vm1934_vm0, %v3144_v23, 0.0  ;;  %3183 = vmatmul.msk.f32.vlgmr.msra.gmra.mxu1 %vm1934_vm0, %v1980_v40  ;;  %v2229_v25 = vperm.slane %v1980_v40, 7  ;;  %v2215_v26 = vperm.slane %v1980_v40, 5  ;;  %v2201_v27 = vperm.slane %v1980_v40, 3  ;;  %2604 = vmatpush.bf16.msra.mxu3 %v3366_v0  ;;  %v3374_v6 = vld [vmem:[%s3956_s5 + $0x98] sm:$0xff]  ;;  %v3371_v23 = vld [vmem:[%s3956_s5 + $0x80] sm:$0xff] }
 0x9aa   : > { %v1991_v28 = vrot.slane %v1990_v24, 4  ;;  %v2187_v34 = vperm.slane %v1980_v40, 1  ;;  %v2180_v14 = vperm.slane %v1980_v40, 0  ;;  %v2222_v36 = vperm.slane %v1980_v40, 6 }
 0x9ab   : > { %2234 = vperm.xlu0 %3481, %v2229_v25   ;;  %2220 = vperm.xlu1 %3483, %v2215_v26   ;;  %v2208_v42 = vperm.slane %v1980_v40, 4  ;;  %v2194_v63 = vperm.slane %v1980_v40, 2  ;;  %v2178_v40 = vrot.slane %v2171_v15, 4 }
 0x9ac   : > { %v1992_v44 = vadd.f32 %v1991_v28, %v1990_v24  ;;  %2206 = vperm.xlu2 %3482, %v2201_v27   ;;  %v2174_v24 = vrot.slane %v2159_v22, 4  ;;  %v2155_v28 = vperm.slane %v4318_v49, %v4015_v62 }
 0x9ad   : > { %2605 = vmatpush.bf16.msra.mxu3 %v3365_v5  ;;  %v2179_v25 = vsel %vm1068_vm7, 0.0, %v2178_v40 }
 0x9ae   : > { %v1993_v30 = vrot.slane %v1992_v44, 2 }
 0x9b0   : > { %v1994_v33 = vadd.f32 %v1993_v30, %v1992_v44  ;;  %v2177_v30 = vsel %vm1068_vm7, 0.0, %v2176_v29 }
 0x9b1   : > { %2606 = vmatpush.bf16.msra.mxu3 %v3364_v9 }
 0x9b2   : > { %v1995_v35 = vrot.slane %v1994_v33, 1 }
 0x9b3   : > { %2192 = vperm.xlu1 %3483, %v2187_v34   ;;  %2185 = vperm.xlu0 %3481, %v2180_v14   ;;  %v2175_v34 = vsel %vm1068_vm7, 0.0, %v2174_v24  ;;  %v2172_v14 = vrot.slane %v2155_v28, 4 }
 0x9b4   : > { %v1996_v56 = vadd.f32 %v1995_v35, %v1994_v33  ;;  %2227 = vperm.xlu2 %3482, %v2222_v36  }
 0x9b5   : > { %2607 = vmatpush.bf16.msra.mxu3 %v3363_v17 }
 0x9b6   : > { %v2007_v39 = vmul.f32 %v3145_v1, %v1996_v56  ;;  %v3375_v1 = vld [vmem:[%s3956_s5 + $0xa0] sm:$0xff]  ;;  %s4617_s5 = sld [smem:[#allocation38_spill]] (!%p3312_p1) }
 0x9b7   : > { %2616 = vmatpush.bf16.msrb.mxu0 %v3375_v1 }
 0x9b8   : > { %v2008_v41 = vadd.f32 %v2007_v39, %v2006_v38  ;;  %v2173_v38 = vsel %vm1068_vm7, 0.0, %v2172_v14 }
 0x9ba   : > { %2009 = vst.msk [vmem:[%s3967_s24] sm:$0x3] %vm2004_vm8, %v2008_v41 }
 0x9bb   : > { %2213 = vperm.xlu1 %3483, %v2208_v42   ;;  %2617 = vmatpush.bf16.msrb.mxu0 %v3374_v6 }
 0x9bc   : > { %2199 = vperm.xlu2 %3482, %v2194_v63  }
 0x9bf   : > { %2618 = vmatpush.bf16.msrb.mxu0 %v3373_v11 }
 0x9c3   : > { %2619 = vmatpush.bf16.msrb.mxu0 %v3372_v18 }
 0x9c7   : > { %2620 = vmatpush.bf16.msrb.mxu0 %v3371_v23 }
 0xa06   : > { %v2207_v3 = vpop.permute.xlu2 %2206 }
 0xa07   : > { %v2239_v35 = vmul.f32 %v2207_v3, %v2175_v34 }
 0xa09   : > { %v2250_v42 = vrot.slane %v2239_v35, 4 }
 0xa0e   : > { %v2228_v16 = vpop.permute.xlu2 %2227 }
 0xa0f   : > { %v2242_v48 = vmul.f32 %v2228_v16, %v2171_v15 }
 0xa11   : > { %v2256_v59 = vrot.slane %v2242_v48, 4 }
 0xa16   : > { %v2200_v44 = vpop.permute.xlu2 %2199 }
 0xa17   : > { %v2238_v36 = vmul.f32 %v2200_v44, %v2159_v22 }
 0xa19   : > { %v2244_v63 = vrot.slane %v2238_v36, 4 }
 0xa1d   : > { %v2235_v26 = vpop.permute.xlu0 %2234  ;;  %v2221_v27 = vpop.permute.xlu1 %2220 }
 0xa1e   : > { %v2243_v32 = vmul.f32 %v2235_v26, %v2179_v25  ;;  %v2241_v31 = vmul.f32 %v2221_v27, %v2177_v30 }
 0xa20   : > { %v2262_v33 = vrot.slane %v2243_v32, 4 }
 0xa22   : > { %v2263_v56 = vsel %vm1068_vm7, %v2262_v33, %v2241_v31 }
 0xa23   : > { %v2267_v53 = vperm.slane %v2263_v56, %v4010_v51 }
 0xa25   : > { %v2193_v39 = vpop.permute.xlu1 %2192  ;;  %v2186_v41 = vpop.permute.xlu0 %2185  ;;  %v2280_v1 = vrot.slane %v2267_v53, 4 }
 0xa26   : > { %v2237_v49 = vmul.f32 %v2193_v39, %v2173_v38  ;;  %v2236_v43 = vmul.f32 %v2186_v41, %v2155_v28  ;;  %v2392_v22 = vpop.f32.mrf.mxu1 }
 0xa28   : > { %v2251_v45 = vsel %vm1068_vm7, %v2250_v42, %v2237_v49  ;;  %v2245_v37 = vsel %vm1068_vm7, %v2244_v63, %v2236_v43 }
 0xa29   : > { %v2255_v46 = vperm.slane %v2251_v45, %v4010_v51  ;;  %v2249_v47 = vperm.slane %v2245_v37, %v4010_v51 }
 0xa2b   : > { %v2268_v50 = vrot.slane %v2255_v46, 4  ;;  %v2270_v52 = vrot.slane %v2249_v47, 4 }
 0xa2d   : > { %v2269_v54 = vsel %vm1068_vm7, %v2268_v50, %v2249_v47  ;;  %v2271_v55 = vsel %vm1068_vm7, %v2255_v46, %v2270_v52  ;;  %v2214_v58 = vpop.permute.xlu1 %2213 }
 0xa2e   : > { %v2240_v60 = vmul.f32 %v2214_v58, %v2167_v21  ;;  %v2275_v61 = vperm.slane %v2269_v54, %v4015_v62  ;;  %v2279_v2 = vperm.slane %v2271_v55, %v4015_v62 }
 0xa30   : > { %v2257_v0 = vsel %vm1068_vm7, %v2256_v59, %v2240_v60  ;;  %v2294_v7 = vrot.slane %v2275_v61, 4  ;;  %v2298_v12 = vrot.slane %v2279_v2, 4 }
 0xa31   : > { %v2261_v3 = vperm.slane %v2257_v0, %v4010_v51 }
 0xa33   : > { %v2281_v4 = vsel %vm1068_vm7, %v2280_v1, %v2261_v3  ;;  %v2282_v5 = vrot.slane %v2261_v3, 4 }
 0xa34   : > { %v2287_v6 = vperm.slane %v2281_v4, %v4015_v62 }
 0xa35   : > { %v2283_v8 = vsel %vm1068_vm7, %v2267_v53, %v2282_v5 }
 0xa36   : > { %v2295_v9 = vsel %vm1068_vm7, %v2287_v6, %v2294_v7  ;;  %v2292_v11 = vrot.slane %v2287_v6, 4  ;;  %v2291_v13 = vperm.slane %v2283_v8, %v4015_v62 }
 0xa37   : > { %v2301_v15 = vpack.c.bf16 %v2295_v9, %v2295_v9 }
 0xa38   : > { %v2293_v16 = vsel %vm1068_vm7, %v2292_v11, %v2275_v61  ;;  %v2299_v51 = vsel %vm1068_vm7, %v2291_v13, %v2298_v12  ;;  %v2296_v17 = vrot.slane %v2291_v13, 4 }
 0xa39   : > { %2608 = vmatmul.bf16.vlgmr.msra.gmra.mxu3 %v2301_v15  ;;  %v2300_v18 = vpack.c.bf16 %v2293_v16, %v2293_v16  ;;  %v2303_v19 = vpack.c.bf16 %v2299_v51, %v2299_v51 }
 0xa3a   : > { %v2297_v20 = vsel %vm1068_vm7, %v2296_v17, %v2279_v2 }
 0xa3b   : > { %2595 = vmatmul.bf16.vlgmr.msra.gmra.mxu2 %v2300_v18  ;;  %2634 = vmatmul.bf16.vlgmr.msrb.gmra.mxu1 %v2303_v19  ;;  %v2302_v21 = vpack.c.bf16 %v2297_v20, %v2297_v20 }
 0xa3d   : > { %2621 = vmatmul.bf16.vlgmr.msrb.gmra.mxu0 %v2302_v21 }
 0xab8   : > { %v2635_v40 = vpop.f32.mrf.mxu1 }
 0xaba   : > { %v2622_v23 = vpop.f32.mrf.mxu0 }
 0xabc   : > { %v2609_v62 = vpop.f32.mrf.mxu3 }
 0xabe   : > { %v2596_v29 = vpop.f32.mrf.mxu2 }
 0xabf   : > { %v2597_v24 = vadd.f32 %v2596_v29, %v2392_v22 }
 0xac0   : > { %v2637_v25 = vpop.f32.mrf.mxu1 }
 0xac1   : > { %v2610_v26 = vadd.f32 %v2609_v62, %v2597_v24 }
 0xac2   : > { %v2624_v27 = vpop.f32.mrf.mxu0 }
 0xac3   : > { %v2623_v28 = vadd.f32 %v2622_v23, %v2610_v26 }
 0xac4   : > { %v2611_v32 = vpop.f32.mrf.mxu3 }
 0xac5   : > { %v2636_v44 = vadd.f32 %v2635_v40, %v2623_v28  ;;  %2644 = sbr.rel (%p3312_p1) target bundleno = 3166 (0xc5e), region = 108 }
 0xac6   : > { %v2598_v30 = vpop.f32.mrf.mxu2 }
 0xac7   : > { %v2639_v33 = vadd.f32 %v2636_v44, %v4252_v57 }
 0xac9   : > { %2640 = vst.msk [vmem:[#allocation2] sm:$0xff] %vm986_vm2, %v2639_v33 }
 0xaca   : > { %v2647_v31 = vsel %vm986_vm2, %v2639_v33, 0.0  ;;  %v3388_v57 = vld [vmem:[%s4617_s5 + $0x8] sm:$0xff]  ;;  %v3387_v38 = vld [vmem:[%s4617_s5] sm:$0xff] }
 0xacb   : > { %2648 = vadd.xlane.f32.xlu0 %v2647_v31  ;;  %2707 = vmatpush.bf16.msra.mxu0 %v3388_v57  ;;  %v3516_v47 = vld [vmem:[%s4618_s30] ss:$0 sm:$0xff] }
 0xacc   : > { %v3518_v55 = vld [vmem:[%s4620_s17] ss:$0 sm:$0xff] }
 0xacf   : > { %2708 = vmatpush.bf16.msra.mxu0 %v3387_v38 }
 0xb3e   : > { %v2649_v34 = vpop.xlane.xlu0 %2648 }
 0xb3f   : > { %v2650_v14 = vmul.f32 %v2649_v34, %v3976_v10 }
 0xb41   : > { %v2651_v35 = vsub.f32 %v2639_v33, %v2650_v14 }
 0xb43   : > { %v2652_v36 = vmul.f32 %v2651_v35, %v2651_v35 }
 0xb45   : > { %v2653_v56 = vsel %vm986_vm2, %v2652_v36, 0.0 }
 0xb46   : > { %2654 = vadd.xlane.f32.xlu0 %v2653_v56 }
 0xbb9   : > { %v2655_v39 = vpop.xlane.xlu0 %2654 }
 0xbba   : > { %v2656_v41 = vmul.f32 %v2655_v39, %v3976_v10  ;;  %v3517_v10 = vld [vmem:[%s4619_s22] ss:$0 sm:$0xff] }
 0xbbc   : > { %v2657_v42 = vadd.f32 1e-05, %v2656_v41 }
 0xbbe   : > { %3519 = vrsqrt.f32 %v2657_v42  ;;  %vm2664_vm10 = vweird.f32 %v2657_v42 }
 0xbc4   : > { %v3520_v63 = vpop.eup %3519 }
 0xbc5   : > { %v2659_v49 = vmul.f32 %v3520_v63, %v2657_v42  ;;  %vm2665_vm7 = vweird.f32 %v3520_v63 }
 0xbc6   : > { %vm2666_vm13 = vmor %vm2664_vm10, %vm2665_vm7 }
 0xbc7   : > { %v2660_v43 = vmul.f32 %v3520_v63, %v2659_v49 }
 0xbc9   : > { %v2661_v45 = vmul.f32 0.5, %v2660_v43 }
 0xbcb   : > { %v2662_v37 = vsub.f32 1.5, %v2661_v45 }
 0xbcd   : > { %v2663_v46 = vmul.f32 %v3520_v63, %v2662_v37 }
 0xbcf   : > { %v2667_v48 = vsel %vm2666_vm13, %v3520_v63, %v2663_v46 }
 0xbd0   : > { %v2668_v50 = vmul.f32 %v2667_v48, %v2651_v35 }
 0xbd2   : > { %v2672_v52 = vmul.f32 %v3516_v47, %v2668_v50 }
 0xbd4   : > { %v2676_v53 = vadd.f32 %v3517_v10, %v2672_v52 }
 0xbd6   : > { %v2677_v54 = vpack.c.bf16 %v2676_v53, %v2676_v53 }
 0xbd8   : > { %3321 = vmatmul.msk.bf16.vlgmr.msra.gmra.mxu0 %vm986_vm2, %v2677_v54 }
 0xc55   : > { %v2710_v58 = vpop.f32.mrf.mxu0 }
 0xc56   : > { %v2711_v59 = vadd.f32 %v3518_v55, %v2710_v58 }
 0xc58   : > { %v2714_v60 = vpack.c.bf16 %v2711_v59, %v2711_v59 }
 0xc5a   : > { %2715 = vst [vmem:[%s3963_s1] sm:$0xf] %v2714_v60 }
 0xc5d   : > { %v2712_v61 = vpop.f32.mrf.mxu0 }
 0xc5e PF: > { %s4621_s18 = sld [smem:[#allocation17_spill]]  ;;  %s2753_s3 = sshll.u32 %s3965_s4, 4  ;;  %s2754_s3 = int_to_ptr.vmem [resolvable:$true] %s2753_s3 }
 0xc5f   : > { %s4623_s6 = sld [smem:[#allocation14_spill]] }
 0xc60   : > { %s4625_s21 = sld [smem:[#allocation41_spill]] }
 0xc64   : > { %s4622_s23 = sadd.s32 4294967295, %s4621_s18  }
 0xc65   : > { %s4428_s28 = sand.u32 1, %s4622_s23   ;;  %s3326_s25 = sshll.u32 %s4623_s6, 1 }
 0xc66   : > { %s2751_s15 = scalar_lea.hbm %s4625_s21, %s3326_s25  ;;  %s2722_s30 = scalar_lea.sflag [#allocation6], %s4428_s28 }
 0xc67   : > { %s2755_s29 = sshll.u32 %s2751_s15, 4  ;;  %s3541_s16 = scalar_lea.hbm %s4625_s21, 4  ;;  %s2756_s29 = int_to_ptr.hbm [resolvable:$true] %s2755_s29 }
 0xc68   : > { %s3535_s0 = sshra.s32 %s2756_s29, 4  ;;  %s3536_s0 = int_to_ptr.hbm [resolvable:$true] %s3535_s0 }
 0xc69   : > { %s3537_s20 = scalar_lea.hbm %s3536_s0, 2  ;;  %p3542_p6 = scmp.lt.s32.totalorder %s3536_s0, %s4625_s21 }
 0xc6a   : > { %p3538_p2 = scmp.ne.s32.totalorder %s3536_s0, %s3537_s20  ;;  %p3543_p7 = scmp.lt.s32.totalorder %s3541_s16, %s3537_s20 }
 0xc6c   : > { %p3539_p4 = pnand %p3538_p2, %p3854_p3  ;;  %p3544_p8 = por %p3543_p7, %p3542_p6 }
 0xc6e   : > { %p3540_p5 = pneg %p3539_p4 }
 0xc70   : > { %p3545_p10 = pnand %p3544_p8, %p3540_p5 }
 0xc72   : > { %3548 = shalt.err (!%p3545_p10)
}
 0xc73   : > { %s4626_s4 = sld [smem:[#allocation23_spill]]  ;;  %s3325_s23 = sshll.u32 %s4623_s6, 2 }
 0xc74   : > { %3390 = dma.vmem_to_hbm [thread:$0]  (%p3854_p3), %s2754_s3, 32, %s2756_s29, %s2722_s30  }
 0xc75   : > { %s4627_s15 = sld [smem:[#allocation40_spill]]  ;;  %s2739_s26 = sshll.u32 %s3963_s1, 4  ;;  %s2740_s26 = int_to_ptr.vmem [resolvable:$true] %s2739_s26 }
 0xc76   : > { %s4628_s17 = sld [smem:[#allocation42_spill]] }
 0xc79   : > { %s2717_s5 = scalar_lea.sflag [#allocation4], %s4626_s4 }
 0xc7b   : > { %s2737_s22 = scalar_lea.hbm %s4627_s15, %s3325_s23  ;;  %s3569_s29 = scalar_lea.hbm %s4627_s15, 8 }
 0xc7c   : > { %s2741_s0 = sshll.u32 %s2737_s22, 4  ;;  %s2765_s18 = scalar_lea.hbm %s4628_s17, %s3326_s25  ;;  %s2742_s0 = int_to_ptr.hbm [resolvable:$true] %s2741_s0 }
 0xc7d   : > { %s3563_s7 = sshra.s32 %s2742_s0, 4  ;;  %s3564_s7 = int_to_ptr.hbm [resolvable:$true] %s3563_s7 }
 0xc7e   : > { %s3565_s8 = scalar_lea.hbm %s3564_s7, 4  ;;  %p3570_p0 = scmp.lt.s32.totalorder %s3564_s7, %s4627_s15 }
 0xc7f   : > { %p3566_p11 = scmp.ne.s32.totalorder %s3564_s7, %s3565_s8  ;;  %p3571_p1 = scmp.lt.s32.totalorder %s3569_s29, %s3565_s8 }
 0xc81   : > { %p3567_p12 = pnand %p3566_p11, %p3854_p3  ;;  %p3572_p2 = por %p3571_p1, %p3570_p0 }
 0xc83   : > { %p3568_p13 = pneg %p3567_p12 }
 0xc85   : > { %p3573_p4 = pnand %p3572_p2, %p3568_p13 }
 0xc87   : > { %3576 = shalt.err (!%p3573_p4)
}
 0xc88   : > { %3389 = dma.vmem_to_hbm [thread:$0]  (%p3854_p3), %s2740_s26, 64, %s2742_s0, %s2717_s5  }
 0xc89   : > { %s2767_s25 = sshll.u32 %s3967_s24, 4  ;;  %s2769_s4 = sshll.u32 %s2765_s18, 4  ;;  %s2768_s25 = int_to_ptr.vmem [resolvable:$true] %s2767_s25  ;;  %s2770_s4 = int_to_ptr.hbm [resolvable:$true] %s2769_s4 }
 0xc8a   : > { %s3591_s27 = sshra.s32 %s2770_s4, 4  ;;  %s3597_s22 = scalar_lea.hbm %s4628_s17, 4  ;;  %s3592_s27 = int_to_ptr.hbm [resolvable:$true] %s3591_s27 }
 0xc8b   : > { %s3593_s2 = scalar_lea.hbm %s3592_s27, 2  ;;  %p3598_p8 = scmp.lt.s32.totalorder %s3592_s27, %s4628_s17 }
 0xc8c   : > { %p3594_p5 = scmp.ne.s32.totalorder %s3592_s27, %s3593_s2  ;;  %p3599_p10 = scmp.lt.s32.totalorder %s3597_s22, %s3593_s2 }
 0xc8e   : > { %p3595_p6 = pnand %p3594_p5, %p3854_p3  ;;  %p3600_p11 = por %p3599_p10, %p3598_p8 }
 0xc90   : > { %p3596_p7 = pneg %p3595_p6 }
 0xc92   : > { %p3601_p12 = pnand %p3600_p11, %p3596_p7 }
 0xc94   : > { %3604 = shalt.err (!%p3601_p12)
}
 0xc95   : > { %3391 = dma.vmem_to_hbm [thread:$0]  (%p3854_p3), %s2768_s25, 32, %s2770_s4, %s2722_s30  }
 0xc96 PF: > { %s4629_s24 = sld [smem:[#allocation17_spill]] }
 0xc97   : > { %s4630_s5 = sld [smem:[#allocation10_spill]] }
 0xc9c   : > { %p3405_p13 = scmp.ge.s32.totalorder %s4629_s24, 2 }
 0xc9d   : > { %s2781_s0 = sand.u32 1, %s4630_s5  }
 0xc9e   : > { %p3396_p0 = pnand %p3405_p13, %p3866_p9  ;;  %s2782_s18 = scalar_lea.sflag [#allocation4], %s2781_s0 }
 0xca0   : > { %p3397_p1 = pneg %p3396_p0 }
 0xca2   : > { %3638 = dma.done.wait (%p3397_p1), %s2782_s18, 64  }
 0xca3   : > { %3640 = vsyncadd (%p3397_p1), %s2782_s18, 4294967232  ;;  %s4632_s6 = sadd.s32 4294967294, %s4629_s24  }
 0xca4   : > { %s2791_s3 = sand.u32 1, %s4632_s6  }
 0xca5   : > { %s2792_s29 = scalar_lea.sflag [#allocation6], %s2791_s3 }
 0xca6   : > { %3642 = dma.done.wait (%p3397_p1), %s2792_s29, 64  }
 0xca7   : > { %3644 = vsyncadd (%p3397_p1), %s2792_s29, 4294967232  ;;  %s39_s1 = sadd.s32 1, %s4629_s24   ;;  %s4633_s3 = sld [smem:[#allocation11_spill]] }
 0xca8   : > { %p36_p3 = scmp.ge.s32.totalorder %s39_s1, 6   ;;  %s4634_s28 = sld [smem:[#allocation12_spill]] }
 0xca9   : > { %s4635_s29 = sld [smem:[#allocation22_spill]] }
 0xcaa   : > { %s4636_s30 = sld [smem:[#allocation15_spill]]  ;;  %38 = sbr.rel (!%p36_p3) target bundleno = 25 (0x19), region = 220 }
 0xcab   : > { %s4637_s4 = sld [smem:[#allocation16_spill]] }
 0xcac   : > { %s4638_s0 = sld [smem:[#allocation18_spill]] }
 0xcad   : > { %s4639_s23 = sld [smem:[#allocation20_spill]] }
 0xcaf   :  { %2808 = vsyncpa [#allocation4], 1 }
 0xcb0   :  { %2810 = vsyncpa [#allocation4 + $0x1], 1 }
 0xcb1   :  { %2811 = vsyncpa [#allocation6], 1 }
 0xcb2   :  { %2813 = vsyncpa [#allocation6 + $0x1], 1 }

</bundles_post_ra>
